<compile_context>
chip_gen: v5e
topology: v5e:2x2
jax: 0.10.0
libtpu: 0.0.40
codegen_flags: <defaults>
</compile_context>

<pallas_src>
import math
from functools import partial

import jax
import jax.numpy as jnp
from jax.experimental import pallas as pl
from jax.experimental.pallas import tpu as pltpu


def _attention_kernel(x_ref, mask_ref, wqkv_ref, bqkv_ref, wo_ref, bo_ref,
                      out_ref, probs_ref, *, num_heads, head_dim, scale):
    x = x_ref[0]              # [S, H]
    mask = mask_ref[0]        # [1, S] additive mask, broadcasts over query rows
    H = num_heads * head_dim

    # Fused Q|K|V projection: one wide MXU matmul, f32 accumulation.
    qkv = jnp.dot(x, wqkv_ref[...], preferred_element_type=jnp.float32) + bqkv_ref[...]
    q_all = qkv[:, :H] * scale          # fold 1/sqrt(dh) into q (cheap, hidden under MXU)
    k_all = qkv[:, H:2 * H]
    v_all = qkv[:, 2 * H:]

    ctx_parts = []
    for h in range(num_heads):          # static unroll; all slices are lane-static
        lo = h * head_dim
        q = q_all[:, lo:lo + head_dim]  # [S, dh]
        k = k_all[:, lo:lo + head_dim]
        v = v_all[:, lo:lo + head_dim]

        # q @ k^T contracting the LAST dims of both operands -> no XLU transpose.
        scores = jax.lax.dot_general(
            q, k, dimension_numbers=(((1,), (1,)), ((), ())),
            preferred_element_type=jnp.float32)                     # [S, S]
        scores = scores + mask

        m = jnp.max(scores, axis=-1, keepdims=True)
        e = jnp.exp(scores - m)
        denom = jnp.sum(e, axis=-1, keepdims=True)
        probs = e * pl.reciprocal(denom, approx=False)              # S recips, not S^2 divides
        # TODO(synk): attention_probs_dropout / hidden_dropout are identity (eval/inference).
        probs_ref[0, h] = probs.astype(probs_ref.dtype)

        ctx_parts.append(jnp.dot(probs, v, preferred_element_type=jnp.float32))  # [S, dh]

    ctx = jnp.concatenate(ctx_parts, axis=-1)                       # [S, H]
    out = jnp.dot(ctx, wo_ref[...], preferred_element_type=jnp.float32) + bo_ref[...]
    out_ref[0] = out.astype(out_ref.dtype)


def roberta_attention(hidden_states, attention_mask,
                      wq, bq, wk, bk, wv, bv, wo, bo, *, num_heads):
    """hidden_states: [B, S, H]; attention_mask: [B, S] additive (0 / -10000)."""
    B, S, H = hidden_states.shape
    assert H % num_heads == 0
    dh = H // num_heads
    assert S % 8 == 0 and H % 128 == 0, "expect TPU-aligned shapes"

    # One-time layout plumbing (torch Linear stores W as [out, in]; kernel does x @ W^T):
    wqkv = jnp.concatenate([wq.T, wk.T, wv.T], axis=1)      # [H, 3H]
    bqkv = jnp.concatenate([bq, bk, bv]).reshape(1, 3 * H)  # [1, 3H]
    wo_t = wo.T                                             # [H, H]
    bo_r = bo.reshape(1, H)                                 # [1, H]
    mask = attention_mask.reshape(B, 1, S).astype(jnp.float32)

    kernel = partial(_attention_kernel, num_heads=num_heads, head_dim=dh,
                     scale=1.0 / math.sqrt(dh))

    out, probs = pl.pallas_call(
        kernel,
        out_shape=(jax.ShapeDtypeStruct((B, S, H), hidden_states.dtype),
                   jax.ShapeDtypeStruct((B, num_heads, S, S), jnp.float32)),
        grid_spec=pltpu.PrefetchScalarGridSpec(
            num_scalar_prefetch=0,
            grid=(B,),
            in_specs=[
                pl.BlockSpec((1, S, H),   lambda b: (b, 0, 0)),   # hidden_states
                pl.BlockSpec((1, 1, S),   lambda b: (b, 0, 0)),   # additive mask
                pl.BlockSpec((H, 3 * H),  lambda b: (0, 0)),      # Wq|Wk|Wv (resident)
                pl.BlockSpec((1, 3 * H),  lambda b: (0, 0)),      # bq|bk|bv
                pl.BlockSpec((H, H),      lambda b: (0, 0)),      # Wo^T   (resident)
                pl.BlockSpec((1, H),      lambda b: (0, 0)),      # bo
            ],
            out_specs=[
                pl.BlockSpec((1, S, H),            lambda b: (b, 0, 0)),      # attention_output
                pl.BlockSpec((1, num_heads, S, S), lambda b: (b, 0, 0, 0)),   # attention_probs
            ],
        ),
        compiler_params=pltpu.CompilerParams(
            dimension_semantics=("parallel",)),
    )(hidden_states, mask, wqkv, bqkv, wo_t, bo_r)
    return out, probs


def reference(hidden_states, attention_mask, wq, bq, wk, bk, wv, bv, wo, bo, num_heads):
    B, S, H = hidden_states.shape
    dh = H // num_heads

    def split(t):
        return t.reshape(B, S, num_heads, dh).transpose(0, 2, 1, 3)

    q = split(hidden_states @ wq.T + bq)
    k = split(hidden_states @ wk.T + bk)
    v = split(hidden_states @ wv.T + bv)
    scores = jnp.einsum('bnqd,bnkd->bnqk', q, k) / math.sqrt(dh)
    scores = scores + attention_mask[:, None, None, :]
    probs = jax.nn.softmax(scores, axis=-1)
    ctx = jnp.einsum('bnqk,bnkd->bnqd', probs, v)
    ctx = ctx.transpose(0, 2, 1, 3).reshape(B, S, H)
    out = ctx @ wo.T + bo
    return out, probs


if __name__ == "__main__":
    key = jax.random.PRNGKey(0)
    B, S, H, NH = 2, 128, 128, 2

    ks = jax.random.split(key, 10)
    x = jax.random.normal(ks[0], (B, S, H), jnp.float32)
    # Additive mask in {0, -10000}: ~20% of key positions masked out.
    mask_bits = jax.random.bernoulli(ks[1], 0.2, (B, S))
    attention_mask = jnp.where(mask_bits, -10000.0, 0.0).astype(jnp.float32)

    wscale = 1.0 / math.sqrt(H)
    wq = jax.random.normal(ks[2], (H, H), jnp.float32) * wscale
    wk = jax.random.normal(ks[3], (H, H), jnp.float32) * wscale
    wv = jax.random.normal(ks[4], (H, H), jnp.float32) * wscale
    wo = jax.random.normal(ks[5], (H, H), jnp.float32) * wscale
    bq = jax.random.normal(ks[6], (H,), jnp.float32) * 0.02
    bk = jax.random.normal(ks[7], (H,), jnp.float32) * 0.02
    bv = jax.random.normal(ks[8], (H,), jnp.float32) * 0.02
    bo = jax.random.normal(ks[9], (H,), jnp.float32) * 0.02

    out, probs = roberta_attention(x, attention_mask, wq, bq, wk, bk, wv, bv, wo, bo,
                                   num_heads=NH)
    out = jax.block_until_ready(out)

    ref_out, ref_probs = reference(x, attention_mask, wq, bq, wk, bk, wv, bv, wo, bo, NH)
    assert out.shape == (B, S, H) and probs.shape == (B, NH, S, S)
    assert jnp.allclose(probs, ref_probs, atol=2e-3, rtol=2e-3), "probs mismatch vs reference"
    assert jnp.allclose(out, ref_out, atol=2e-3, rtol=2e-3), "output mismatch vs reference"
    print("KERNEL_OK")
</pallas_src>

<mosaic_0001>
module attributes {stable_mosaic.version = 11 : i64} {
  func.func @_attention_kernel(%arg0: i32, %arg1: memref<1x128x128xf32, #tpu.memory_space<vmem>>, %arg2: memref<1x1x128xf32, #tpu.memory_space<vmem>>, %arg3: memref<128x384xf32, #tpu.memory_space<vmem>>, %arg4: memref<1x384xf32, #tpu.memory_space<vmem>>, %arg5: memref<128x128xf32, #tpu.memory_space<vmem>>, %arg6: memref<1x128xf32, #tpu.memory_space<vmem>>, %arg7: memref<1x128x128xf32, #tpu.memory_space<vmem>>, %arg8: memref<1x2x128x128xf32, #tpu.memory_space<vmem>>) attributes {dimension_semantics = [#tpu.dimension_semantics<parallel>], iteration_bounds = array<i64: 2>, scalar_prefetch = 0 : i64, scratch_operands = 0 : i64, tpu.core_type = #tpu.core_type<tc>, window_params = [{transform_indices = @transform_0, window_bounds = array<i64: 1, 128, 128>}, {transform_indices = @transform_1, window_bounds = array<i64: 1, 1, 128>}, {pipeline_mode = #tpu.pipeline_mode<synchronous>, transform_indices = @transform_2, window_bounds = array<i64: 128, 384>}, {pipeline_mode = #tpu.pipeline_mode<synchronous>, transform_indices = @transform_3, window_bounds = array<i64: 1, 384>}, {pipeline_mode = #tpu.pipeline_mode<synchronous>, transform_indices = @transform_4, window_bounds = array<i64: 128, 128>}, {pipeline_mode = #tpu.pipeline_mode<synchronous>, transform_indices = @transform_5, window_bounds = array<i64: 1, 128>}, {transform_indices = @transform_6, window_bounds = array<i64: 1, 128, 128>}, {transform_indices = @transform_7, window_bounds = array<i64: 1, 2, 128, 128>}]} {
    %c0 = arith.constant 0 : index
    %c0_0 = arith.constant 0 : index
    %c0_1 = arith.constant 0 : index
    %0 = vector.load %arg1[%c0, %c0_0, %c0_1] : memref<1x128x128xf32, #tpu.memory_space<vmem>>, vector<1x128x128xf32>
    %1 = vector.shape_cast %0 : vector<1x128x128xf32> to vector<128x128xf32>
    %c0_2 = arith.constant 0 : index
    %c0_3 = arith.constant 0 : index
    %c0_4 = arith.constant 0 : index
    %2 = vector.load %arg2[%c0_2, %c0_3, %c0_4] : memref<1x1x128xf32, #tpu.memory_space<vmem>>, vector<1x1x128xf32>
    %3 = vector.shape_cast %2 : vector<1x1x128xf32> to vector<1x128xf32>
    %c0_5 = arith.constant 0 : index
    %c0_6 = arith.constant 0 : index
    %4 = vector.load %arg3[%c0_5, %c0_6] : memref<128x384xf32, #tpu.memory_space<vmem>>, vector<128x384xf32>
    %cst = arith.constant dense<0.000000e+00> : vector<128x384xf32>
    %5 = tpu.matmul %1, %4, %cst {dimension_numbers = #tpu.dot_dimension_numbers<[1], [0], [0], [1], [0, 0, 1, 1], [], []>} : vector<128x128xf32>, vector<128x384xf32>, vector<128x384xf32> -> vector<128x384xf32>
    %c0_7 = arith.constant 0 : index
    %c0_8 = arith.constant 0 : index
    %6 = vector.load %arg4[%c0_7, %c0_8] : memref<1x384xf32, #tpu.memory_space<vmem>>, vector<1x384xf32>
    %7 = vector.broadcast %6 : vector<1x384xf32> to vector<128x384xf32>
    %8 = arith.addf %5, %7 : vector<128x384xf32>
    %9 = vector.extract_strided_slice %8 {offsets = [0, 0], sizes = [128, 128], strides = [1, 1]} : vector<128x384xf32> to vector<128x128xf32>
    %cst_9 = arith.constant 1.250000e-01 : f32
    %10 = vector.broadcast %cst_9 : f32 to vector<128x128xf32>
    %11 = arith.mulf %9, %10 : vector<128x128xf32>
    %12 = vector.extract_strided_slice %8 {offsets = [0, 128], sizes = [128, 128], strides = [1, 1]} : vector<128x384xf32> to vector<128x128xf32>
    %13 = vector.extract_strided_slice %8 {offsets = [0, 256], sizes = [128, 128], strides = [1, 1]} : vector<128x384xf32> to vector<128x128xf32>
    %14 = vector.extract_strided_slice %11 {offsets = [0, 0], sizes = [128, 64], strides = [1, 1]} : vector<128x128xf32> to vector<128x64xf32>
    %15 = vector.extract_strided_slice %12 {offsets = [0, 0], sizes = [128, 64], strides = [1, 1]} : vector<128x128xf32> to vector<128x64xf32>
    %16 = vector.extract_strided_slice %13 {offsets = [0, 0], sizes = [128, 64], strides = [1, 1]} : vector<128x128xf32> to vector<128x64xf32>
    %cst_10 = arith.constant dense<0.000000e+00> : vector<128x128xf32>
    %17 = tpu.matmul %14, %15, %cst_10 {dimension_numbers = #tpu.dot_dimension_numbers<[1], [1], [0], [0], [0, 0, 1, 0], [], []>} : vector<128x64xf32>, vector<128x64xf32>, vector<128x128xf32> -> vector<128x128xf32>
    %18 = vector.broadcast %3 : vector<1x128xf32> to vector<128x128xf32>
    %19 = arith.addf %17, %18 : vector<128x128xf32>
    %cst_11 = arith.constant dense<0xFF800000> : vector<128xf32>
    %20 = vector.multi_reduction <maximumf>, %19, %cst_11 [1] : vector<128x128xf32> to vector<128xf32>
    %21 = vector.shape_cast %20 : vector<128xf32> to vector<128x1xf32>
    %22 = vector.broadcast %21 : vector<128x1xf32> to vector<128x128xf32>
    %23 = arith.subf %19, %22 : vector<128x128xf32>
    %24 = math.exp %23 : vector<128x128xf32>
    %cst_12 = arith.constant dense<0.000000e+00> : vector<128xf32>
    %25 = vector.multi_reduction <add>, %24, %cst_12 [1] : vector<128x128xf32> to vector<128xf32>
    %26 = vector.shape_cast %25 : vector<128xf32> to vector<128x1xf32>
    %27 = tpu.reciprocal %26 : vector<128x1xf32> -> vector<128x1xf32>
    %28 = vector.broadcast %27 : vector<128x1xf32> to vector<128x128xf32>
    %29 = arith.mulf %24, %28 : vector<128x128xf32>
    %c0_13 = arith.constant 0 : index
    %c0_14 = arith.constant 0 : index
    %c0_15 = arith.constant 0 : index
    %c0_16 = arith.constant 0 : index
    %30 = vector.load %arg8[%c0_13, %c0_14, %c0_15, %c0_16] : memref<1x2x128x128xf32, #tpu.memory_space<vmem>>, vector<1x1x128x128xf32>
    %31 = vector.shape_cast %30 : vector<1x1x128x128xf32> to vector<128x128xf32>
    %32 = vector.shape_cast %29 : vector<128x128xf32> to vector<1x1x128x128xf32>
    tpu.vector_store %arg8[%c0_13, %c0_14, %c0_15, %c0_16], %32 {strides = array<i32>} : memref<1x2x128x128xf32, #tpu.memory_space<vmem>>, vector<1x1x128x128xf32>,
    %cst_17 = arith.constant dense<0.000000e+00> : vector<128x64xf32>
    %33 = tpu.matmul %29, %16, %cst_17 {dimension_numbers = #tpu.dot_dimension_numbers<[1], [0], [0], [1], [0, 0, 1, 1], [], []>} : vector<128x128xf32>, vector<128x64xf32>, vector<128x64xf32> -> vector<128x64xf32>
    %34 = vector.extract_strided_slice %11 {offsets = [0, 64], sizes = [128, 64], strides = [1, 1]} : vector<128x128xf32> to vector<128x64xf32>
    %35 = vector.extract_strided_slice %12 {offsets = [0, 64], sizes = [128, 64], strides = [1, 1]} : vector<128x128xf32> to vector<128x64xf32>
    %36 = vector.extract_strided_slice %13 {offsets = [0, 64], sizes = [128, 64], strides = [1, 1]} : vector<128x128xf32> to vector<128x64xf32>
    %cst_18 = arith.constant dense<0.000000e+00> : vector<128x128xf32>
    %37 = tpu.matmul %34, %35, %cst_18 {dimension_numbers = #tpu.dot_dimension_numbers<[1], [1], [0], [0], [0, 0, 1, 0], [], []>} : vector<128x64xf32>, vector<128x64xf32>, vector<128x128xf32> -> vector<128x128xf32>
    %38 = vector.broadcast %3 : vector<1x128xf32> to vector<128x128xf32>
    %39 = arith.addf %37, %38 : vector<128x128xf32>
    %cst_19 = arith.constant dense<0xFF800000> : vector<128xf32>
    %40 = vector.multi_reduction <maximumf>, %39, %cst_19 [1] : vector<128x128xf32> to vector<128xf32>
    %41 = vector.shape_cast %40 : vector<128xf32> to vector<128x1xf32>
    %42 = vector.broadcast %41 : vector<128x1xf32> to vector<128x128xf32>
    %43 = arith.subf %39, %42 : vector<128x128xf32>
    %44 = math.exp %43 : vector<128x128xf32>
    %cst_20 = arith.constant dense<0.000000e+00> : vector<128xf32>
    %45 = vector.multi_reduction <add>, %44, %cst_20 [1] : vector<128x128xf32> to vector<128xf32>
    %46 = vector.shape_cast %45 : vector<128xf32> to vector<128x1xf32>
    %47 = tpu.reciprocal %46 : vector<128x1xf32> -> vector<128x1xf32>
    %48 = vector.broadcast %47 : vector<128x1xf32> to vector<128x128xf32>
    %49 = arith.mulf %44, %48 : vector<128x128xf32>
    %c0_21 = arith.constant 0 : index
    %c1 = arith.constant 1 : index
    %c0_22 = arith.constant 0 : index
    %c0_23 = arith.constant 0 : index
    %50 = vector.load %arg8[%c0_21, %c1, %c0_22, %c0_23] : memref<1x2x128x128xf32, #tpu.memory_space<vmem>>, vector<1x1x128x128xf32>
    %51 = vector.shape_cast %50 : vector<1x1x128x128xf32> to vector<128x128xf32>
    %52 = vector.shape_cast %49 : vector<128x128xf32> to vector<1x1x128x128xf32>
    tpu.vector_store %arg8[%c0_21, %c1, %c0_22, %c0_23], %52 {strides = array<i32>} : memref<1x2x128x128xf32, #tpu.memory_space<vmem>>, vector<1x1x128x128xf32>,
    %cst_24 = arith.constant dense<0.000000e+00> : vector<128x64xf32>
    %53 = tpu.matmul %49, %36, %cst_24 {dimension_numbers = #tpu.dot_dimension_numbers<[1], [0], [0], [1], [0, 0, 1, 1], [], []>} : vector<128x128xf32>, vector<128x64xf32>, vector<128x64xf32> -> vector<128x64xf32>
    %54 = tpu.concatenate %33, %53 in 1 : vector<128x64xf32>, vector<128x64xf32> -> vector<128x128xf32>
    %c0_25 = arith.constant 0 : index
    %c0_26 = arith.constant 0 : index
    %55 = vector.load %arg5[%c0_25, %c0_26] : memref<128x128xf32, #tpu.memory_space<vmem>>, vector<128x128xf32>
    %cst_27 = arith.constant dense<0.000000e+00> : vector<128x128xf32>
    %56 = tpu.matmul %54, %55, %cst_27 {dimension_numbers = #tpu.dot_dimension_numbers<[1], [0], [0], [1], [0, 0, 1, 1], [], []>} : vector<128x128xf32>, vector<128x128xf32>, vector<128x128xf32> -> vector<128x128xf32>
    %c0_28 = arith.constant 0 : index
    %c0_29 = arith.constant 0 : index
    %57 = vector.load %arg6[%c0_28, %c0_29] : memref<1x128xf32, #tpu.memory_space<vmem>>, vector<1x128xf32>
    %58 = vector.broadcast %57 : vector<1x128xf32> to vector<128x128xf32>
    %59 = arith.addf %56, %58 : vector<128x128xf32>
    %c0_30 = arith.constant 0 : index
    %c0_31 = arith.constant 0 : index
    %c0_32 = arith.constant 0 : index
    %60 = vector.load %arg7[%c0_30, %c0_31, %c0_32] : memref<1x128x128xf32, #tpu.memory_space<vmem>>, vector<1x128x128xf32>
    %61 = vector.shape_cast %60 : vector<1x128x128xf32> to vector<128x128xf32>
    %62 = vector.shape_cast %59 : vector<128x128xf32> to vector<1x128x128xf32>
    tpu.vector_store %arg7[%c0_30, %c0_31, %c0_32], %62 {strides = array<i32>} : memref<1x128x128xf32, #tpu.memory_space<vmem>>, vector<1x128x128xf32>,
    return
  }
  func.func @transform_0(%arg0: i32) -> (i32, i32, i32) {
    %c0_i32 = arith.constant 0 : i32
    %c0_i32_0 = arith.constant 0 : i32
    %c0_i32_1 = arith.constant 0 : i32
    return %arg0, %c0_i32, %c0_i32_0 : i32, i32, i32
  }
  func.func @transform_1(%arg0: i32) -> (i32, i32, i32) {
    %c0_i32 = arith.constant 0 : i32
    %c0_i32_0 = arith.constant 0 : i32
    %c0_i32_1 = arith.constant 0 : i32
    return %arg0, %c0_i32, %c0_i32_0 : i32, i32, i32
  }
  func.func @transform_2(%arg0: i32) -> (i32, i32) {
    %c0_i32 = arith.constant 0 : i32
    %c0_i32_0 = arith.constant 0 : i32
    %c0_i32_1 = arith.constant 0 : i32
    return %c0_i32, %c0_i32_0 : i32, i32
  }
  func.func @transform_3(%arg0: i32) -> (i32, i32) {
    %c0_i32 = arith.constant 0 : i32
    %c0_i32_0 = arith.constant 0 : i32
    %c0_i32_1 = arith.constant 0 : i32
    return %c0_i32, %c0_i32_0 : i32, i32
  }
  func.func @transform_4(%arg0: i32) -> (i32, i32) {
    %c0_i32 = arith.constant 0 : i32
    %c0_i32_0 = arith.constant 0 : i32
    %c0_i32_1 = arith.constant 0 : i32
    return %c0_i32, %c0_i32_0 : i32, i32
  }
  func.func @transform_5(%arg0: i32) -> (i32, i32) {
    %c0_i32 = arith.constant 0 : i32
    %c0_i32_0 = arith.constant 0 : i32
    %c0_i32_1 = arith.constant 0 : i32
    return %c0_i32, %c0_i32_0 : i32, i32
  }
  func.func @transform_6(%arg0: i32) -> (i32, i32, i32) {
    %c0_i32 = arith.constant 0 : i32
    %c0_i32_0 = arith.constant 0 : i32
    %c0_i32_1 = arith.constant 0 : i32
    return %arg0, %c0_i32, %c0_i32_0 : i32, i32, i32
  }
  func.func @transform_7(%arg0: i32) -> (i32, i32, i32, i32) {
    %c0_i32 = arith.constant 0 : i32
    %c0_i32_0 = arith.constant 0 : i32
    %c0_i32_1 = arith.constant 0 : i32
    %c0_i32_2 = arith.constant 0 : i32
    return %arg0, %c0_i32, %c0_i32_0, %c0_i32_1 : i32, i32, i32, i32
  }
}

</mosaic_0001>

<bundles_post_ra>
// kernel: tpu_custom_call.1
= control target key start
LH: loop header
LB: loop body
LE: loop exit
PB: predicated region body
PF: predicated region fallthrough
CT: control target
= control target key end

     0   :  { %s4301_s0 = inlined_call_operand.hbm [shape: f32[2,128,128], index: 0, kind: input, shape index: {}]   ;;  %s4302_s1 = inlined_call_operand.hbm [shape: f32[2,1,128], index: 1, kind: input, shape index: {}]   ;;  %s4303_s2 = inlined_call_operand.hbm [shape: f32[128,384], index: 2, kind: input, shape index: {}]   ;;  %s4304_s3 = inlined_call_operand.hbm [shape: f32[1,384], index: 3, kind: input, shape index: {}]   ;;  %s4305_s4 = inlined_call_operand.hbm [shape: f32[128,128], index: 4, kind: input, shape index: {}]   ;;  %s4306_s5 = inlined_call_operand.vmem [shape: f32[1,128], index: 5, kind: input, shape index: {}]   ;;  %s4307_s6 = inlined_call_operand.hbm [shape: f32[2,128,128], index: 6, kind: output, shape index: {0}]   ;;  %s4308_s7 = inlined_call_operand.hbm [shape: f32[2,2,128,128], index: 7, kind: output, shape index: {1}]  }
   0x1   :  { %4314 = sst [smem:[#allocation23_spill]] %s4301_s0 }
   0x2   :  { %4315 = sst [smem:[#allocation24_spill]] %s4303_s2 }
   0x3   :  { %4316 = sst [smem:[#allocation25_spill]] %s4304_s3 }
   0x4   :  { %4317 = sst [smem:[#allocation26_spill]] %s4305_s4 }
   0x5   :  { %13 = vsyncpa [#allocation3], 0 }
   0x6   :  { %15 = vsyncpa [#allocation3 + $0x1], 0 }
   0x7   :  { %16 = vsyncpa [#allocation6], 0 }
   0x8   :  { %18 = vsyncpa [#allocation6 + $0x1], 0 }
   0x9   :  { %19 = vsyncpa [#allocation9], 0 }
   0xa   :  { %20 = vsyncpa [#allocation4], 0 }
   0xb   :  { %22 = vsyncpa [#allocation4 + $0x1], 0 }
   0xc   :  { %23 = vsyncpa [#allocation13], 0 }
   0xd   :  { %25 = vsyncpa [#allocation13 + $0x1], 0  ;;  %s3079_s24 = smov 0   ;;  %s3081_s25 = smov 0  }
   0xe   :  { %s3083_s26 = smov 0   ;;  %s3085_s27 = smov 0  }
   0xf LB: > { %4318 = sst [smem:[#allocation20_spill]] %s3023_s26  ;;  %s3100_s28 = sadd.s32 4294967295, %s3027_s27   ;;  %s3027_s27 = sphi %s3085_s27, %s4348_s27   ;;  %s3023_s26 = sphi %s3083_s26, %s4350_s26   ;;  %s3019_s25 = sphi %s3081_s25, %s4352_s25   ;;  %s3015_s24 = sphi %s3079_s24, %s4351_s24  }
  0x10   : > { %s2337_s29 = sadd.s32 4294967294, %s3027_s27   ;;  %p51_p0 = scmp.ne.s32.totalorder %s3019_s25, %s3015_s24 }
  0x11   : > { %p52_p1 = scmp.eq.s32.totalorder %s3100_s28, 0  ;;  %p185_p2 = scmp.eq.s32.totalorder %s3100_s28, 1 }
  0x12   : > { %p191_p3 = scmp.eq.s32.totalorder %s2337_s29, 1  ;;  %p2338_p5 = scmp.ge.s32.totalorder %s3027_s27, 1 }
  0x13   : > { %p3109_p4 = por %p52_p1, %p51_p0  ;;  %p224_p7 = scmp.lt.s32.totalorder %s3027_s27, 3 }
  0x14   : > { %p3114_p6 = por %p191_p3, %p51_p0  ;;  %s4321_s2 = sld [smem:[#allocation24_spill]] }
  0x15   : > { %p3122_p8 = pnand %p2338_p5, %p224_p7  ;;  %s3029_s13 = smov [#allocation7]  }
  0x16   : > { %s237_s14 = sshll.u32 %s3029_s13, 4  ;;  %s4324_s3 = sld [smem:[#allocation25_spill]]  ;;  %s238_s14 = int_to_ptr.vmem [resolvable:$true] %s237_s14 }
  0x17   : > { %p2512_p9 = pneg %p3122_p8  ;;  %s3030_s19 = smov 384  }
  0x18   : > { %s3031_s20 = smov 24   ;;  %s3032_s21 = smov [#allocation8]  }
  0x19   : > { %p3130_p10 = pnand %p2512_p9, %p52_p1  ;;  %s252_s22 = sshll.u32 %s3032_s21, 4  ;;  %s253_s22 = int_to_ptr.vmem [resolvable:$true] %s252_s22 }
  0x1a   : > { %s235_s11 = sshll.u32 %s4321_s2, 4  ;;  %s4325_s4 = sld [smem:[#allocation26_spill]]  ;;  %s236_s11 = int_to_ptr.hbm [resolvable:$true] %s235_s11 }
  0x1b   : > { %2515 = dma.hbm_to_vmem [thread:$0]  (!%p3130_p10), %s236_s11, 6144, %s238_s14, [#allocation6], %s3030_s19, %s3030_s19, %s3031_s20  }
  0x1c   : > { %s250_s18 = sshll.u32 %s4324_s3, 4  ;;  %s3033_s10 = smov [#allocation10]   ;;  %s251_s18 = int_to_ptr.hbm [resolvable:$true] %s250_s18 }
  0x1d   : > { %2518 = dma.hbm_to_vmem [thread:$0]  (!%p3130_p10), %s251_s18, 48, %s253_s22, [#allocation9]  }
  0x1e   : > { %s263_s13 = sshll.u32 %s3033_s10, 4  ;;  %s4309_s11 = smov 128   ;;  %s264_s13 = int_to_ptr.vmem [resolvable:$true] %s263_s13 }
  0x1f   : > { %s4310_s14 = smov 8   ;;  %s3151_s16 = sadd.s32 1, %s3027_s27  }
  0x20   : > { %s261_s9 = sshll.u32 %s4325_s4, 4  ;;  %4326 = sst [smem:[#allocation21_spill]] %s3151_s16  ;;  %s262_s9 = int_to_ptr.hbm [resolvable:$true] %s261_s9 }
  0x21   : > { %2521 = dma.hbm_to_vmem [thread:$0]  (!%p3130_p10), %s262_s9, 2048, %s264_s13, [#allocation9], %s4309_s11, %s4309_s11, %s4310_s14  }
  0x22   : > { %s35_s17 = ssub.s32 %s3027_s27, %s3151_s16  ;;  %s38_s19 = sadd.s32 1, %s3023_s26 }
  0x23   : > { %p36_p12 = scmp.eq.s32.totalorder %s35_s17, 0  ;;  %p45_p13 = scmp.ne.s32.totalorder %s3023_s26, %s3019_s25 }
  0x24   : > { %p46_p0 = scmp.eq.s32.totalorder %s3027_s27, 0  ;;  %p2539_p3 = scmp.lt.s32.totalorder %s3027_s27, 2 }
  0x25   : > { %s3161_s18 = scalar_select %p36_p12, %s3023_s26, %s38_s19  }
  0x26   : > { %p47_p5 = por %p46_p0, %p45_p13  ;;  %p3165_p7 = por %p185_p2, %p45_p13 }
  0x27   : > { %4327 = sst [smem:[#allocation22_spill]] %s3161_s18  ;;  %s3170_s20 = sand.u32 1, %s3023_s26  }
  0x28   : > { %s2441_s21 = sshll.u32 %s3027_s27, 7  ;;  %s2343_s22 = sshll.u32 %s3170_s20, 7 }
  0x29   : > { %s4329_s0 = sld [smem:[#allocation23_spill]]  ;;  %s284_s13 = scalar_lea.vmem [#allocation2], %s2343_s22 }
  0x2a   : > { %s292_s17 = sshll.u32 %s284_s13, 4  ;;  %p3179_p2 = pnand %p2539_p3, %p47_p5  ;;  %s293_s17 = int_to_ptr.vmem [resolvable:$true] %s292_s17 }
  0x2b   : > { %s302_s11 = sand.u32 1, %s3027_s27   ;;  %s308_s3 = scalar_lea.hbm %s4302_s1, %s3027_s27 }
  0x2c   : > { %s281_s4 = scalar_lea.sflag [#allocation3], %s3170_s20  ;;  %p2861_p10 = pneg %p3179_p2 }
  0x2f   : > { %s289_s9 = scalar_lea.hbm %s4329_s0, %s2441_s21 }
  0x30   : > { %s290_s10 = sshll.u32 %s289_s9, 4  ;;  %s2864_s9 = scalar_lea.hbm %s4329_s0, 256  ;;  %s291_s10 = int_to_ptr.hbm [resolvable:$true] %s290_s10 }
  0x31   : > { %s2857_s23 = sshra.s32 %s291_s10, 4  ;;  %s2858_s23 = int_to_ptr.hbm [resolvable:$true] %s2857_s23 }
  0x32   : > { %s2859_s21 = scalar_lea.hbm %s2858_s23, 128  ;;  %p2865_p0 = scmp.lt.s32.totalorder %s2858_s23, %s4329_s0 }
  0x33   : > { %p2860_p9 = scmp.ne.s32.totalorder %s2858_s23, %s2859_s21  ;;  %p2866_p3 = scmp.lt.s32.totalorder %s2864_s9, %s2859_s21 }
  0x35   : > { %p2862_p12 = pnand %p2861_p10, %p2860_p9  ;;  %p2867_p5 = por %p2866_p3, %p2865_p0 }
  0x37   : > { %p2863_p13 = pneg %p2862_p12 }
  0x39   : > { %p2868_p11 = pnand %p2867_p5, %p2863_p13 }
  0x3b   : > { %2871 = shalt.err (!%p2868_p11)
}
  0x3c   : > { %s4331_s2 = smov 8   ;;  %s4332_s14 = smov 128  }
  0x3d   : > { %2525 = dma.hbm_to_vmem [thread:$0]  (!%p3179_p2), %s291_s10, 2048, %s293_s17, %s281_s4, %s4332_s14, %s4332_s14, %s4331_s2  }
  0x3e   : > { %s310_s26 = sshll.u32 %s308_s3, 4  ;;  %s305_s16 = scalar_lea.vmem [#allocation5], %s3170_s20  ;;  %s311_s26 = int_to_ptr.hbm [resolvable:$true] %s310_s26 }
  0x3f   : > { %s312_s22 = sshll.u32 %s305_s16, 4  ;;  %s303_s29 = scalar_lea.sflag [#allocation6], %s302_s11  ;;  %s313_s22 = int_to_ptr.vmem [resolvable:$true] %s312_s22 }
  0x40   : > { %s2887_s18 = sshra.s32 %s311_s26, 4  ;;  %s2894_s13 = scalar_lea.hbm %s4302_s1, 2  ;;  %s2888_s18 = int_to_ptr.hbm [resolvable:$true] %s2887_s18 }
  0x41   : > { %s2889_s23 = scalar_lea.hbm %s2888_s18, 1  ;;  %p2895_p13 = scmp.lt.s32.totalorder %s2888_s18, %s4302_s1 }
  0x42   : > { %p2890_p9 = scmp.ne.s32.totalorder %s2888_s18, %s2889_s23  ;;  %p2896_p0 = scmp.lt.s32.totalorder %s2894_s13, %s2889_s23 }
  0x44   : > { %p2892_p11 = pnand %p2890_p9, %p2861_p10  ;;  %p2897_p3 = por %p2896_p0, %p2895_p13 }
  0x46   : > { %p2893_p12 = pneg %p2892_p11 }
  0x48   : > { %p2898_p5 = pnand %p2897_p3, %p2893_p12 }
  0x4a   : > { %2901 = shalt.err (!%p2898_p5)
}
  0x4b   : > { %2528 = dma.hbm_to_vmem [thread:$0]  (!%p3179_p2), %s311_s26, 16, %s313_s22, %s303_s29  }
  0x4c   : > { %321 = sbr.rel (%p3122_p8) target bundleno = 1581 (0x62d), region = 44  ;;  %s3220_s3 = sand.u32 (!%p3122_p8), 1, %s3019_s25  }
  0x4d   : > { %s2347_s11 = sshll.u32 (!%p3122_p8), %s3220_s3, 7  ;;  %s324_s0 = scalar_lea.sflag (!%p3122_p8), [#allocation3], %s3220_s3 }
  0x4e   : > { %s3226_s16 = scalar_lea.vmem (!%p3122_p8), [#allocation2], %s2347_s11 }
  0x51   : > { %2990 = dma.done.wait (%p3109_p4), %s324_s0, 2048  }
  0x52   : > { %2992 = vsyncadd (%p3109_p4), %s324_s0, 4294965248  ;;  %s333_s26 = sand.u32 1, %s3100_s28   ;;  %s336_s20 = scalar_lea.vmem [#allocation5], %s3220_s3 }
  0x53   : > { %s334_s12 = scalar_lea.sflag [#allocation6], %s333_s26 }
  0x54   : > { %2994 = dma.done.wait (%p3109_p4), %s334_s12, 16  }
  0x55   : > { %2996 = vsyncadd (%p3109_p4), %s334_s12, 4294967280 }
  0x56   : > { %2998 = dma.done.wait (%p52_p1), [#allocation6], 6144  }
  0x57   : > { %3000 = vsyncadd (%p52_p1), [#allocation6], 4294961152 }
  0x58   : > { %3002 = dma.done.wait (%p52_p1), [#allocation9], 2096  }
  0x59   : > { %3004 = vsyncadd (%p52_p1), [#allocation9], 4294965200  ;;  %v455_v0 = vld [vmem:[#allocation7 + $0x170] sm:$0xff]  ;;  %v452_v1 = vld [vmem:[#allocation7 + $0x158] sm:$0xff]  ;;  %s3036_s30 = smov 64   ;;  %vm679_vm0 = vcmask 523264  }
  0x5a   : > { %530 = vmatpush.msra.mxu1 %v455_v0  ;;  %v449_v2 = vld [vmem:[#allocation7 + $0x140] sm:$0xff]  ;;  %v446_v3 = vld [vmem:[#allocation7 + $0x128] sm:$0xff]  ;;  %v443_v4 = vld [vmem:[#allocation7 + $0x110] sm:$0xff]  ;;  %s2352_s10 = sshll.u32 %s3220_s3, 8  ;;  %s4210_s14 = scalar_lea.vmem [#allocation11], %s2347_s11 }
  0x5b   : > { %v440_v5 = vld [vmem:[#allocation7 + $0xf8] sm:$0xff]  ;;  %v437_v6 = vld [vmem:[#allocation7 + $0xe0] sm:$0xff]  ;;  %v434_v7 = vld [vmem:[#allocation7 + $0xc8] sm:$0xff]  ;;  %s3797_s17 = scalar_lea.vmem [#allocation12], %s2352_s10  ;;  %s2443_s22 = sshll.u32 %s3100_s28, 8 }
  0x5c   : > { %531 = vmatpush.msra.mxu1 %v452_v1  ;;  %v431_v8 = vld [vmem:[#allocation7 + $0xb0] sm:$0xff]  ;;  %v428_v9 = vld [vmem:[#allocation7 + $0x98] sm:$0xff]  ;;  %v425_v10 = vld [vmem:[#allocation7 + $0x80] sm:$0xff]  ;;  %s2181_s29 = sshll.u32 %s3797_s17, 4  ;;  %s2180_s21 = scalar_lea.hbm %s4308_s7, %s2443_s22  ;;  %s2182_s29 = int_to_ptr.vmem [resolvable:$true] %s2181_s29 }
  0x5d   : > { %v422_v11 = vld [vmem:[#allocation7 + $0x68] sm:$0xff]  ;;  %v419_v12 = vld [vmem:[#allocation7 + $0x50] sm:$0xff]  ;;  %v416_v13 = vld [vmem:[#allocation7 + $0x38] sm:$0xff]  ;;  %s2183_s9 = sshll.u32 %s2180_s21, 4  ;;  %s2152_s13 = scalar_lea.sflag [#allocation13], %s3220_s3  ;;  %s2184_s9 = int_to_ptr.hbm [resolvable:$true] %s2183_s9 }
  0x5e   : > { %532 = vmatpush.msra.mxu1 %v449_v2  ;;  %v413_v14 = vld [vmem:[#allocation7 + $0x20] sm:$0xff]  ;;  %v410_v15 = vld [vmem:[#allocation7 + $0x8] sm:$0xff]  ;;  %v3259_v19 = vld [vmem:[%s3226_s16 + $0x18] sm:$0xff]  ;;  %s2931_s4 = sshra.s32 %s2184_s9, 4  ;;  %s2937_s26 = scalar_lea.hbm %s4308_s7, 512  ;;  %s2932_s4 = int_to_ptr.hbm [resolvable:$true] %s2931_s4 }
  0x5f   : > { %v3247_v16 = vld [vmem:[%s3226_s16] sm:$0xff]  ;;  %v3251_v17 = vld [vmem:[%s3226_s16 + $0x8] sm:$0xff]  ;;  %v3255_v18 = vld [vmem:[%s3226_s16 + $0x10] sm:$0xff]  ;;  %s2933_s11 = scalar_lea.hbm %s2932_s4, 256  ;;  %p2938_p2 = scmp.lt.s32.totalorder %s2932_s4, %s4308_s7 }
  0x60   : > { %533 = vmatpush.msra.mxu1 %v446_v3  ;;  %v3263_v20 = vld [vmem:[%s3226_s16 + $0x20] sm:$0xff]  ;;  %v3267_v21 = vld [vmem:[%s3226_s16 + $0x28] sm:$0xff]  ;;  %v3271_v22 = vld [vmem:[%s3226_s16 + $0x30] sm:$0xff]  ;;  %p2934_p1 = scmp.ne.s32.totalorder %s2932_s4, %s2933_s11  ;;  %p2939_p10 = scmp.lt.s32.totalorder %s2937_s26, %s2933_s11 }
  0x61   : > { %v3275_v23 = vld [vmem:[%s3226_s16 + $0x38] sm:$0xff]  ;;  %v453_v25 = vld [vmem:[#allocation7 + $0x160] sm:$0xff]  ;;  %v450_v26 = vld [vmem:[#allocation7 + $0x148] sm:$0xff] }
  0x62   : > { %534 = vmatpush.msra.mxu1 %v443_v4  ;;  %v456_v24 = vld [vmem:[#allocation7 + $0x178] sm:$0xff]  ;;  %v447_v27 = vld [vmem:[#allocation7 + $0x130] sm:$0xff]  ;;  %v441_v30 = vld [vmem:[#allocation7 + $0x100] sm:$0xff]  ;;  %p2935_p4 = pnand %p2934_p1, %p3165_p7  ;;  %p2940_p9 = por %p2939_p10, %p2938_p2 }
  0x63   : > { %595 = vmatpush.msra.mxu2 %v456_v24  ;;  %v3279_v28 = vld [vmem:[%s3226_s16 + $0x40] sm:$0xff]  ;;  %v438_v31 = vld [vmem:[#allocation7 + $0xe8] sm:$0xff]  ;;  %v435_v32 = vld [vmem:[#allocation7 + $0xd0] sm:$0xff] }
  0x64   : > { %535 = vmatpush.msra.mxu1 %v440_v5  ;;  %v444_v29 = vld [vmem:[#allocation7 + $0x118] sm:$0xff]  ;;  %v3283_v33 = vld [vmem:[%s3226_s16 + $0x48] sm:$0xff]  ;;  %v423_v37 = vld [vmem:[#allocation7 + $0x70] sm:$0xff]  ;;  %p2936_p8 = pneg %p2935_p4 }
  0x65   : > { %596 = vmatpush.msra.mxu2 %v453_v25  ;;  %v432_v34 = vld [vmem:[#allocation7 + $0xb8] sm:$0xff]  ;;  %v429_v35 = vld [vmem:[#allocation7 + $0xa0] sm:$0xff]  ;;  %v426_v36 = vld [vmem:[#allocation7 + $0x88] sm:$0xff] }
  0x66   : > { %536 = vmatpush.msra.mxu1 %v437_v6  ;;  %v3287_v38 = vld [vmem:[%s3226_s16 + $0x50] sm:$0xff]  ;;  %v420_v39 = vld [vmem:[#allocation7 + $0x58] sm:$0xff]  ;;  %v417_v40 = vld [vmem:[#allocation7 + $0x40] sm:$0xff]  ;;  %p2941_p11 = pnand %p2940_p9, %p2936_p8 }
  0x67   : > { %597 = vmatpush.msra.mxu2 %v450_v26  ;;  %v414_v41 = vld [vmem:[#allocation7 + $0x28] sm:$0xff]  ;;  %v411_v42 = vld [vmem:[#allocation7 + $0x10] sm:$0xff]  ;;  %v3296_v46 = vld [vmem:[%s3226_s16 + $0x60] sm:$0xff] }
  0x68   : > { %537 = vmatpush.msra.mxu1 %v434_v7  ;;  %v3291_v43 = vld [vmem:[%s3226_s16 + $0x58] sm:$0xff]  ;;  %v454_v44 = vld [vmem:[#allocation7 + $0x168] sm:$0xff]  ;;  %v445_v48 = vld [vmem:[#allocation7 + $0x120] sm:$0xff] }
  0x69   : > { %598 = vmatpush.msra.mxu2 %v447_v27  ;;  %v451_v45 = vld [vmem:[#allocation7 + $0x150] sm:$0xff]  ;;  %465 = vmatpush.msra.mxu0 %v454_v44  ;;  %v448_v47 = vld [vmem:[#allocation7 + $0x138] sm:$0xff]  ;;  %v442_v49 = vld [vmem:[#allocation7 + $0x108] sm:$0xff] }
  0x6a   : > { %538 = vmatpush.msra.mxu1 %v431_v8  ;;  %v439_v50 = vld [vmem:[#allocation7 + $0xf0] sm:$0xff]  ;;  %v3301_v51 = vld [vmem:[%s3226_s16 + $0x68] sm:$0xff]  ;;  %v436_v52 = vld [vmem:[#allocation7 + $0xd8] sm:$0xff] }
  0x6b   : > { %599 = vmatpush.msra.mxu2 %v444_v29  ;;  %466 = vmatpush.msra.mxu0 %v451_v45  ;;  %v433_v53 = vld [vmem:[#allocation7 + $0xc0] sm:$0xff]  ;;  %v430_v54 = vld [vmem:[#allocation7 + $0xa8] sm:$0xff]  ;;  %v427_v55 = vld [vmem:[#allocation7 + $0x90] sm:$0xff] }
  0x6c   : > { %539 = vmatpush.msra.mxu1 %v428_v9  ;;  %v3306_v56 = vld [vmem:[%s3226_s16 + $0x70] sm:$0xff]  ;;  %v424_v57 = vld [vmem:[#allocation7 + $0x78] sm:$0xff]  ;;  %v421_v58 = vld [vmem:[#allocation7 + $0x60] sm:$0xff] }
  0x6d   : > { %600 = vmatpush.msra.mxu2 %v441_v30  ;;  %467 = vmatpush.msra.mxu0 %v448_v47  ;;  %v418_v59 = vld [vmem:[#allocation7 + $0x48] sm:$0xff]  ;;  %v415_v60 = vld [vmem:[#allocation7 + $0x30] sm:$0xff]  ;;  %v412_v62 = vld [vmem:[#allocation7 + $0x18] sm:$0xff] }
  0x6e   : > { %540 = vmatpush.msra.mxu1 %v425_v10  ;;  %v3311_v61 = vld [vmem:[%s3226_s16 + $0x78] sm:$0xff]  ;;  %v409_v63 = vld [vmem:[#allocation7] sm:$0xff] }
  0x6f   : > { %601 = vmatpush.msra.mxu2 %v438_v31  ;;  %468 = vmatpush.msra.mxu0 %v445_v48 }
  0x70   : > { %541 = vmatpush.msra.mxu1 %v422_v11  ;;  %v3345_v11 = vld [vmem:[#allocation8] sm:$0x7] }
  0x71   : > { %602 = vmatpush.msra.mxu2 %v435_v32  ;;  %469 = vmatpush.msra.mxu0 %v442_v49 }
  0x72   : > { %542 = vmatpush.msra.mxu1 %v419_v12  ;;  %v3349_v12 = vperm.slane %v3345_v11, 1 }
  0x73   : > { %603 = vmatpush.msra.mxu2 %v432_v34  ;;  %470 = vmatpush.msra.mxu0 %v439_v50  ;;  %v3393_v34 = vperm.slane %v3345_v11, 0 }
  0x74   : > { %543 = vmatpush.msra.mxu1 %v416_v13 }
  0x75   : > { %604 = vmatpush.msra.mxu2 %v429_v35  ;;  %471 = vmatpush.msra.mxu0 %v436_v52 }
  0x76   : > { %544 = vmatpush.msra.mxu1 %v413_v14 }
  0x77   : > { %605 = vmatpush.msra.mxu2 %v426_v36  ;;  %472 = vmatpush.msra.mxu0 %v433_v53 }
  0x78   : > { %545 = vmatpush.msra.mxu1 %v410_v15 }
  0x79   : > { %546 = vmatmul.f32.vlgmr.msra.gmra.mxu1 %v3247_v16  ;;  %606 = vmatpush.msra.mxu2 %v423_v37 }
  0x7a   : > { %473 = vmatpush.msra.mxu0 %v430_v54 }
  0x7b   : > { %607 = vmatpush.msra.mxu2 %v420_v39 }
  0x7c   : > { %474 = vmatpush.msra.mxu0 %v427_v55 }
  0x7d   : > { %608 = vmatpush.msra.mxu2 %v417_v40 }
  0x7e   : > { %475 = vmatpush.msra.mxu0 %v424_v57 }
  0x7f   : > { %609 = vmatpush.msra.mxu2 %v414_v41 }
  0x80   : > { %476 = vmatpush.msra.mxu0 %v421_v58 }
  0x81   : > { %549 = vmatmul.f32.gmra.mxu1 %v3251_v17  ;;  %610 = vmatpush.msra.mxu2 %v411_v42 }
  0x82   : > { %611 = vmatmul.f32.vlgmr.msra.gmra.mxu2 %v3247_v16  ;;  %477 = vmatpush.msra.mxu0 %v418_v59 }
  0x84   : > { %478 = vmatpush.msra.mxu0 %v415_v60 }
  0x86   : > { %479 = vmatpush.msra.mxu0 %v412_v62 }
  0x88   : > { %480 = vmatpush.msra.mxu0 %v409_v63 }
  0x89   : > { %552 = vmatmul.f32.gmra.mxu1 %v3255_v18  ;;  %481 = vmatmul.f32.vlgmr.msra.gmra.mxu0 %v3247_v16 }
  0x8a   : > { %614 = vmatmul.f32.gmra.mxu2 %v3251_v17 }
  0x91   : > { %555 = vmatmul.f32.gmra.mxu1 %v3259_v19  ;;  %484 = vmatmul.f32.gmra.mxu0 %v3251_v17 }
  0x92   : > { %617 = vmatmul.f32.gmra.mxu2 %v3255_v18 }
  0x99   : > { %558 = vmatmul.f32.gmra.mxu1 %v3263_v20  ;;  %487 = vmatmul.f32.gmra.mxu0 %v3255_v18 }
  0x9a   : > { %620 = vmatmul.f32.gmra.mxu2 %v3259_v19 }
  0xa1   : > { %561 = vmatmul.f32.gmra.mxu1 %v3267_v21  ;;  %490 = vmatmul.f32.gmra.mxu0 %v3259_v19 }
  0xa2   : > { %623 = vmatmul.f32.gmra.mxu2 %v3263_v20 }
  0xa9   : > { %564 = vmatmul.f32.gmra.mxu1 %v3271_v22  ;;  %493 = vmatmul.f32.gmra.mxu0 %v3263_v20 }
  0xaa   : > { %626 = vmatmul.f32.gmra.mxu2 %v3267_v21 }
  0xb1   : > { %567 = vmatmul.f32.gmra.mxu1 %v3275_v23  ;;  %496 = vmatmul.f32.gmra.mxu0 %v3267_v21 }
  0xb2   : > { %629 = vmatmul.f32.gmra.mxu2 %v3271_v22 }
  0xb9   : > { %570 = vmatmul.f32.gmra.mxu1 %v3279_v28  ;;  %499 = vmatmul.f32.gmra.mxu0 %v3271_v22 }
  0xba   : > { %632 = vmatmul.f32.gmra.mxu2 %v3275_v23 }
  0xc1   : > { %573 = vmatmul.f32.gmra.mxu1 %v3283_v33  ;;  %502 = vmatmul.f32.gmra.mxu0 %v3275_v23 }
  0xc2   : > { %635 = vmatmul.f32.gmra.mxu2 %v3279_v28 }
  0xc9   : > { %576 = vmatmul.f32.gmra.mxu1 %v3287_v38  ;;  %505 = vmatmul.f32.gmra.mxu0 %v3279_v28 }
  0xca   : > { %638 = vmatmul.f32.gmra.mxu2 %v3283_v33 }
  0xd1   : > { %579 = vmatmul.f32.gmra.mxu1 %v3291_v43  ;;  %508 = vmatmul.f32.gmra.mxu0 %v3283_v33 }
  0xd2   : > { %641 = vmatmul.f32.gmra.mxu2 %v3287_v38 }
  0xd9   : > { %582 = vmatmul.f32.gmra.mxu1 %v3296_v46  ;;  %511 = vmatmul.f32.gmra.mxu0 %v3287_v38 }
  0xda   : > { %644 = vmatmul.f32.gmra.mxu2 %v3291_v43 }
  0xe1   : > { %585 = vmatmul.f32.gmra.mxu1 %v3301_v51  ;;  %514 = vmatmul.f32.gmra.mxu0 %v3291_v43 }
  0xe2   : > { %647 = vmatmul.f32.gmra.mxu2 %v3296_v46 }
  0xe9   : > { %588 = vmatmul.f32.gmra.mxu1 %v3306_v56  ;;  %517 = vmatmul.f32.gmra.mxu0 %v3296_v46 }
  0xea   : > { %650 = vmatmul.f32.gmra.mxu2 %v3301_v51 }
  0xf1   : > { %591 = vmatmul.f32.gmra.mxu1 %v3311_v61  ;;  %520 = vmatmul.f32.gmra.mxu0 %v3301_v51 }
  0xf2   : > { %653 = vmatmul.f32.gmra.mxu2 %v3306_v56 }
  0xf6   : > { %v3316_v0 = vpop.f32.mrf.mxu1 }
  0xf9   : > { %523 = vmatmul.f32.gmra.mxu0 %v3306_v56  ;;  %v548_v56 = vadd.f32 %v3316_v0, %v3349_v12 }
  0xfa   : > { %656 = vmatmul.f32.gmra.mxu2 %v3311_v61 }
  0xfe   : > { %v550_v1 = vpop.f32.mrf.mxu1 }
  0xff   : > { %v3380_v30 = vadd.f32 %v550_v1, %v3349_v12 }
 0x101   : > { %526 = vmatmul.f32.gmra.mxu0 %v3311_v61 }
 0x105   : > { %v3354_v15 = vpop.f32.mrf.mxu2 }
 0x106   : > { %v3322_v2 = vpop.f32.mrf.mxu1  ;;  %v482_v29 = vpop.f32.mrf.mxu0 }
 0x107   : > { %v554_v42 = vadd.f32 %v3322_v2, %v3349_v12  ;;  %v483_v44 = vadd.f32 %v482_v29, %v3393_v34 }
 0x109   : > { %v660_v47 = vmul.f32 0.125, %v483_v44 }
 0x10d   : > { %v3359_v18 = vpop.f32.mrf.mxu2 }
 0x10e   : > { %v3326_v3 = vpop.f32.mrf.mxu1  ;;  %v485_v35 = vpop.f32.mrf.mxu0 }
 0x10f   : > { %v486_v37 = vadd.f32 %v485_v35, %v3393_v34  ;;  %v557_v51 = vadd.f32 %v3326_v3, %v3349_v12 }
 0x111   : > { %v3400_v38 = vmul.f32 0.125, %v486_v37 }
 0x115   : > { %v3366_v22 = vpop.f32.mrf.mxu2 }
 0x116   : > { %v559_v4 = vpop.f32.mrf.mxu1  ;;  %v488_v41 = vpop.f32.mrf.mxu0 }
 0x117   : > { %v3369_v24 = vadd.f32 %v559_v4, %v3349_v12  ;;  %v489_v58 = vadd.f32 %v488_v41, %v3393_v34 }
 0x119   : > { %v662_v60 = vmul.f32 0.125, %v489_v58 }
 0x11d   : > { %v3375_v26 = vpop.f32.mrf.mxu2 }
 0x11e   : > { %v562_v5 = vpop.f32.mrf.mxu1  ;;  %v491_v46 = vpop.f32.mrf.mxu0 }
 0x11f   : > { %v563_v36 = vadd.f32 %v562_v5, %v3349_v12  ;;  %v492_v48 = vadd.f32 %v491_v46, %v3393_v34 }
 0x121   : > { %v663_v50 = vmul.f32 0.125, %v492_v48 }
 0x125   : > { %v3388_v32 = vpop.f32.mrf.mxu2 }
 0x126   : > { %v3334_v6 = vpop.f32.mrf.mxu1  ;;  %v494_v52 = vpop.f32.mrf.mxu0 }
 0x127   : > { %v566_v45 = vadd.f32 %v3334_v6, %v3349_v12  ;;  %v495_v53 = vadd.f32 %v494_v52, %v3393_v34 }
 0x129   : > { %v3431_v54 = vmul.f32 0.125, %v495_v53 }
 0x12d   : > { %v3402_v39 = vpop.f32.mrf.mxu2 }
 0x12e   : > { %v568_v7 = vpop.f32.mrf.mxu1  ;;  %v497_v57 = vpop.f32.mrf.mxu0 }
 0x12f   : > { %v569_v20 = vadd.f32 %v568_v7, %v3349_v12  ;;  %v498_v63 = vadd.f32 %v497_v57, %v3393_v34 }
 0x131   : > { %v665_v2 = vmul.f32 0.125, %v498_v63 }
 0x135   : > { %v3413_v43 = vpop.f32.mrf.mxu2 }
 0x136   : > { %v571_v8 = vpop.f32.mrf.mxu1  ;;  %v500_v61 = vpop.f32.mrf.mxu0 }
 0x137   : > { %v572_v31 = vadd.f32 %v571_v8, %v3349_v12  ;;  %v501_v62 = vadd.f32 %v500_v61, %v3393_v34 }
 0x139   : > { %v3450_v0 = vmul.f32 0.125, %v501_v62 }
 0x13d   : > { %v3423_v49 = vpop.f32.mrf.mxu2 }
 0x13e   : > { %v574_v9 = vpop.f32.mrf.mxu1  ;;  %v503_v3 = vpop.f32.mrf.mxu0 }
 0x13f   : > { %v575_v40 = vadd.f32 %v574_v9, %v3349_v12  ;;  %v504_v4 = vadd.f32 %v503_v3, %v3393_v34 }
 0x141   : > { %v3459_v5 = vmul.f32 0.125, %v504_v4 }
 0x145   : > { %v3433_v55 = vpop.f32.mrf.mxu2 }
 0x146   : > { %v577_v10 = vpop.f32.mrf.mxu1  ;;  %v506_v7 = vpop.f32.mrf.mxu0 }
 0x147   : > { %v578_v17 = vadd.f32 %v577_v10, %v3349_v12  ;;  %v507_v8 = vadd.f32 %v506_v7, %v3393_v34 }
 0x149   : > { %v3466_v9 = vmul.f32 0.125, %v507_v8 }
 0x14d   : > { %v639_v59 = vpop.f32.mrf.mxu2 }
 0x14e   : > { %v580_v13 = vpop.f32.mrf.mxu1 }
 0x14f   : > { %v581_v14 = vadd.f32 %v580_v13, %v3349_v12 }
 0x151   : > { %1328 = vrot.lane.b32.xlu2 %v581_v14, %s3036_s30 }
 0x155   : > { %v642_v1 = vpop.f32.mrf.mxu2 }
 0x156   : > { %v583_v16 = vpop.f32.mrf.mxu1 }
 0x157   : > { %v584_v25 = vadd.f32 %v583_v16, %v3349_v12 }
 0x159   : > { %1326 = vrot.lane.b32.xlu2 %v578_v17, %s3036_s30 }
 0x15d   : > { %v645_v6 = vpop.f32.mrf.mxu2 }
 0x15e   : > { %v586_v19 = vpop.f32.mrf.mxu1 }
 0x15f   : > { %v587_v21 = vadd.f32 %v586_v19, %v3349_v12 }
 0x161   : > { %1332 = vrot.lane.b32.xlu1 %v587_v21, %s3036_s30  ;;  %1320 = vrot.lane.b32.xlu2 %v569_v20, %s3036_s30 }
 0x165   : > { %v648_v10 = vpop.f32.mrf.mxu2 }
 0x166   : > { %v589_v23 = vpop.f32.mrf.mxu1 }
 0x167   : > { %v590_v33 = vadd.f32 %v589_v23, %v3349_v12  ;;  %v461_v23 = vperm.slane %v3345_v11, 2 }
 0x169   : > { %1330 = vrot.lane.b32.xlu1 %v584_v25, %s3036_s30  ;;  %1314 = vrot.lane.b32.xlu2 %v3369_v24, %s3036_s30  ;;  %v649_v35 = vadd.f32 %v648_v10, %v461_v23  ;;  %v643_v37 = vadd.f32 %v642_v1, %v461_v23  ;;  %v637_v41 = vadd.f32 %v3433_v55, %v461_v23 }
 0x16a   : > { %v3509_v46 = vadd.f32 %v3423_v49, %v461_v23  ;;  %v3526_v49 = vadd.f32 %v3388_v32, %v461_v23  ;;  %v3532_v53 = vadd.f32 %v3375_v26, %v461_v23  ;;  %v3544_v32 = vadd.f32 %v3359_v18, %v461_v23 }
 0x16d   : > { %v651_v16 = vpop.f32.mrf.mxu2 }
 0x16e   : > { %v592_v27 = vpop.f32.mrf.mxu1 }
 0x16f   : > { %v593_v28 = vadd.f32 %v592_v27, %v3349_v12  ;;  %v509_v12 = vpop.f32.mrf.mxu0 }
 0x170   : > { %v510_v13 = vadd.f32 %v509_v12, %v3393_v34 }
 0x171   : > { %1336 = vrot.lane.b32.xlu0 %v593_v28, %s3036_s30  ;;  %2353 = vmatpush.xpose.msk.msra.mxu3 %vm679_vm0, %v593_v28 }
 0x172   : > { %1322 = vrot.lane.b32.xlu1 %v572_v31, %s3036_s30  ;;  %1308 = vrot.lane.b32.xlu2 %v3380_v30, %s3036_s30 }
 0x175   : > { %2354 = vmatpush.xpose.msk.msra.mxu3 %vm679_vm0, %v590_v33 }
 0x179   : > { %1334 = vrot.lane.b32.xlu0 %v590_v33, %s3036_s30  ;;  %2355 = vmatpush.xpose.msk.msra.mxu3 %vm679_vm0, %v587_v21  ;;  %v654_v21 = vpop.f32.mrf.mxu2  ;;  %v652_v33 = vadd.f32 %v651_v16, %v461_v23  ;;  %v3602_v16 = vld [vmem:[%s336_s20] ss:$0 sm:$0xff] }
 0x17a   : > { %1316 = vrot.lane.b32.xlu1 %v563_v36, %s3036_s30  ;;  %1276 = vrot.lane.b32.xlu2 %v3400_v38, %s3036_s30 }
 0x17d   : > { %2356 = vmatpush.xpose.msk.msra.mxu3 %vm679_vm0, %v584_v25 }
 0x181   : > { %2357 = vmatpush.xpose.msk.msra.mxu3 %vm679_vm0, %v581_v14  ;;  %1324 = vrot.lane.b32.xlu0 %v575_v40, %s3036_s30  ;;  %v3473_v14 = vmul.f32 0.125, %v510_v13  ;;  %v657_v28 = vpop.f32.mrf.mxu2 }
 0x182   : > { %1310 = vrot.lane.b32.xlu1 %v554_v42, %s3036_s30  ;;  %1282 = vrot.lane.b32.xlu2 %v3431_v54, %s3036_s30  ;;  %v3488_v29 = vadd.f32 %v657_v28, %v461_v23 }
 0x184   : > { %1209 = vmatpush.msrb.mxu0 %v3488_v29 }
 0x185   : > { %2358 = vmatpush.xpose.msk.msra.mxu3 %vm679_vm0, %v578_v17  ;;  %v512_v17 = vpop.f32.mrf.mxu0 }
 0x186   : > { %v513_v19 = vadd.f32 %v512_v17, %v3393_v34 }
 0x189   : > { %2359 = vmatpush.xpose.msk.msra.mxu3 %vm679_vm0, %v575_v40  ;;  %1318 = vrot.lane.b32.xlu0 %v566_v45, %s3036_s30  ;;  %v640_v40 = vadd.f32 %v639_v59, %v461_v23 }
 0x18a   : > { %1274 = vrot.lane.b32.xlu1 %v660_v47, %s3036_s30  ;;  %1288 = vrot.lane.b32.xlu2 %v3459_v5, %s3036_s30 }
 0x18b   : > { %v2596_v57 = vpack.i.bf16 %v637_v41, %v640_v40 }
 0x18d   : > { %2360 = vmatpush.xpose.msk.msra.mxu3 %vm679_vm0, %v572_v31 }
 0x191   : > { %2361 = vmatpush.xpose.msk.msra.mxu3 %vm679_vm0, %v569_v20  ;;  %1312 = vrot.lane.b32.xlu0 %v557_v51, %s3036_s30  ;;  %v3479_v20 = vmul.f32 0.125, %v513_v19 }
 0x192   : > { %1280 = vrot.lane.b32.xlu1 %v663_v50, %s3036_s30 }
 0x193   : > { %1294 = vrot.lane.b32.xlu2 %v3479_v20, %s3036_s30 }
 0x195   : > { %2362 = vmatpush.xpose.msk.msra.mxu3 %vm679_vm0, %v566_v45 }
 0x199   : > { %2363 = vmatpush.xpose.msk.msra.mxu3 %vm679_vm0, %v563_v36  ;;  %1306 = vrot.lane.b32.xlu0 %v548_v56, %s3036_s30 }
 0x19a   : > { %1286 = vrot.lane.b32.xlu1 %v3450_v0, %s3036_s30 }
 0x19d   : > { %2364 = vmatpush.xpose.msk.msra.mxu3 %vm679_vm0, %v3369_v24  ;;  %v515_v24 = vpop.f32.mrf.mxu0 }
 0x19e   : > { %v516_v25 = vadd.f32 %v515_v24, %v3393_v34 }
 0x1a0   : > { %v3486_v27 = vmul.f32 0.125, %v516_v25 }
 0x1a1   : > { %2365 = vmatpush.xpose.msk.msra.mxu3 %vm679_vm0, %v557_v51  ;;  %1278 = vrot.lane.b32.xlu0 %v662_v60, %s3036_s30 }
 0x1a2   : > { %1292 = vrot.lane.b32.xlu1 %v3473_v14, %s3036_s30 }
 0x1a5   : > { %2366 = vmatpush.xpose.msk.msra.mxu3 %vm679_vm0, %v554_v42  ;;  %v518_v31 = vpop.f32.mrf.mxu0 }
 0x1a6   : > { %v519_v11 = vadd.f32 %v518_v31, %v3393_v34 }
 0x1a8   : > { %v3499_v36 = vmul.f32 0.125, %v519_v11 }
 0x1a9   : > { %2367 = vmatpush.xpose.msk.msra.mxu3 %vm679_vm0, %v3380_v30  ;;  %1284 = vrot.lane.b32.xlu0 %v665_v2, %s3036_s30  ;;  %v3492_v30 = vadd.f32 %v654_v21, %v461_v23 }
 0x1aa   : > { %1298 = vrot.lane.b32.xlu1 %v3499_v36, %s3036_s30 }
 0x1ab   : > { %1210 = vmatpush.msrb.mxu0 %v3492_v30 }
 0x1ad   : > { %2368 = vmatpush.xpose.msk.msra.mxu3 %vm679_vm0, %v548_v56  ;;  %1211 = vmatpush.msrb.mxu0 %v652_v33  ;;  %v521_v42 = vpop.f32.mrf.mxu0  ;;  %v3550_v56 = vadd.f32 %v3354_v15, %v461_v23  ;;  %v1329_v15 = vpop.permute.xlu2 %1328 }
 0x1ae   : > { %v522_v44 = vadd.f32 %v521_v42, %v3393_v34 }
 0x1af   : > { %1212 = vmatpush.msrb.mxu0 %v649_v35  ;;  %v2621_v58 = vpack.i.bf16 %v3550_v56, %v3544_v32 }
 0x1b0   : > { %2369 = vmatmul.msk.f32.vlgmr.msra.gmra.mxu3 %vm679_vm0, %v660_v47  ;;  %v3506_v45 = vmul.f32 0.125, %v522_v44  ;;  %v3515_v47 = vadd.f32 %v3413_v43, %v461_v23 }
 0x1b1   : > { %1290 = vrot.lane.b32.xlu0 %v3466_v9, %s3036_s30 }
 0x1b2   : > { %1300 = vrot.lane.b32.xlu2 %v3506_v45, %s3036_s30  ;;  %v2606_v8 = vpack.i.bf16 %v3515_v47, %v3509_v46 }
 0x1b5   : > { %v524_v48 = vpop.f32.mrf.mxu0 }
 0x1b6   : > { %v525_v51 = vadd.f32 %v524_v48, %v3393_v34 }
 0x1b8   : > { %2370 = vmatmul.msk.f32.gmra.mxu3 %vm679_vm0, %v3400_v38  ;;  %v646_v38 = vadd.f32 %v645_v6, %v461_v23  ;;  %v3528_v52 = vmul.f32 0.125, %v525_v51 }
 0x1b9   : > { %1296 = vrot.lane.b32.xlu0 %v3486_v27, %s3036_s30 }
 0x1ba   : > { %1213 = vmatpush.msrb.mxu0 %v646_v38  ;;  %v2591_v26 = vpack.i.bf16 %v643_v37, %v646_v38 }
 0x1bc   : > { %1214 = vmatpush.msrb.mxu0 %v643_v37 }
 0x1bd   : > { %v527_v59 = vpop.f32.mrf.mxu0 }
 0x1be   : > { %1215 = vmatpush.msrb.mxu0 %v640_v40  ;;  %v528_v62 = vadd.f32 %v527_v59, %v3393_v34 }
 0x1c0   : > { %2371 = vmatmul.msk.f32.gmra.mxu3 %vm679_vm0, %v662_v60  ;;  %1216 = vmatpush.msrb.mxu0 %v637_v41  ;;  %v1327_v60 = vpop.permute.xlu2 %1326  ;;  %v675_v63 = vmul.f32 0.125, %v528_v62 }
 0x1c1   : > { %1302 = vrot.lane.b32.xlu0 %v3528_v52, %s3036_s30 }
 0x1c2   : > { %1217 = vmatpush.msrb.mxu0 %v3509_v46  ;;  %1304 = vrot.lane.b32.xlu1 %v675_v63, %s3036_s30 }
 0x1c4   : > { %1218 = vmatpush.msrb.mxu0 %v3515_v47 }
 0x1c8   : > { %2372 = vmatmul.msk.f32.gmra.mxu3 %vm679_vm0, %v663_v50  ;;  %v3519_v50 = vadd.f32 %v3402_v39, %v461_v23  ;;  %v2586_v39 = vpack.i.bf16 %v649_v35, %v652_v33  ;;  %v1321_v3 = vpop.permute.xlu2 %1320 }
 0x1c9   : > { %2592 = vrot.lane.b32.xlu0 %v2591_v26, %s3036_s30 }
 0x1ca   : > { %1219 = vmatpush.msrb.mxu0 %v3519_v50  ;;  %2587 = vrot.lane.b32.xlu2 %v2586_v39, %s3036_s30  ;;  %v2611_v4 = vpack.i.bf16 %v3526_v49, %v3519_v50 }
 0x1cc   : > { %1220 = vmatpush.msrb.mxu0 %v3526_v49 }
 0x1ce   : > { %1221 = vmatpush.msrb.mxu0 %v3532_v53 }
 0x1d0   : > { %2373 = vmatmul.msk.f32.gmra.mxu3 %vm679_vm0, %v3431_v54  ;;  %v3539_v54 = vadd.f32 %v3366_v22, %v461_v23  ;;  %v1315_v6 = vpop.permute.xlu2 %1314 }
 0x1d2   : > { %1222 = vmatpush.msrb.mxu0 %v3539_v54  ;;  %2597 = vrot.lane.b32.xlu2 %v2596_v57, %s3036_s30  ;;  %v2616_v61 = vpack.i.bf16 %v3539_v54, %v3532_v53 }
 0x1d3   : > { %v1333_v55 = vpop.permute.xlu1 %1332 }
 0x1d4   : > { %1223 = vmatpush.msrb.mxu0 %v3544_v32 }
 0x1d6   : > { %1224 = vmatpush.msrb.mxu0 %v3550_v56 }
 0x1d8   : > { %2374 = vmatmul.msk.f32.gmra.mxu3 %vm679_vm0, %v665_v2  ;;  %v2601_v2 = vpack.i.bf16 %v3492_v30, %v3488_v29  ;;  %v1309_v10 = vpop.permute.xlu2 %1308 }
 0x1da   : > { %2602 = vrot.lane.b32.xlu1 %v2601_v2, %s3036_s30 }
 0x1db   : > { %v1331_v18 = vpop.permute.xlu1 %1330 }
 0x1e0   : > { %2375 = vmatmul.msk.f32.gmra.mxu3 %vm679_vm0, %v3450_v0 }
 0x1e3   : > { %v1337_v43 = vpop.permute.xlu0 %1336 }
 0x1e4   : > { %2385 = vmatpush.xpose.msk.msrb.mxu1 %vm679_vm0, %v1337_v43  ;;  %v1323_v1 = vpop.permute.xlu1 %1322 }
 0x1e8   : > { %2376 = vmatmul.msk.f32.gmra.mxu3 %vm679_vm0, %v3459_v5 }
 0x1eb   : > { %v1335_v22 = vpop.permute.xlu0 %1334 }
 0x1ec   : > { %2386 = vmatpush.xpose.msk.msrb.mxu1 %vm679_vm0, %v1335_v22  ;;  %v1317_v5 = vpop.permute.xlu1 %1316 }
 0x1f0   : > { %2387 = vmatpush.xpose.msk.msrb.mxu1 %vm679_vm0, %v1333_v55  ;;  %2377 = vmatmul.msk.f32.gmra.mxu3 %vm679_vm0, %v3466_v9 }
 0x1f3   : > { %v1325_v0 = vpop.permute.xlu0 %1324 }
 0x1f4   : > { %2388 = vmatpush.xpose.msk.msrb.mxu1 %vm679_vm0, %v1331_v18  ;;  %v1311_v9 = vpop.permute.xlu1 %1310 }
 0x1f8   : > { %2389 = vmatpush.xpose.msk.msrb.mxu1 %vm679_vm0, %v1329_v15  ;;  %2378 = vmatmul.msk.f32.gmra.mxu3 %vm679_vm0, %v3473_v14  ;;  %v1277_v14 = vpop.permute.xlu2 %1276 }
 0x1fb   : > { %v1319_v34 = vpop.permute.xlu0 %1318 }
 0x1fc   : > { %2390 = vmatpush.xpose.msk.msrb.mxu1 %vm679_vm0, %v1327_v60  ;;  %v1275_v13 = vpop.permute.xlu1 %1274 }
 0x200   : > { %2391 = vmatpush.xpose.msk.msrb.mxu1 %vm679_vm0, %v1325_v0  ;;  %2379 = vmatmul.msk.f32.gmra.mxu3 %vm679_vm0, %v3479_v20  ;;  %v1283_v25 = vpop.permute.xlu2 %1282 }
 0x203   : > { %v1313_v7 = vpop.permute.xlu0 %1312 }
 0x204   : > { %2392 = vmatpush.xpose.msk.msrb.mxu1 %vm679_vm0, %v1323_v1  ;;  %v1281_v24 = vpop.permute.xlu1 %1280 }
 0x208   : > { %2393 = vmatpush.xpose.msk.msrb.mxu1 %vm679_vm0, %v1321_v3  ;;  %2380 = vmatmul.msk.f32.gmra.mxu3 %vm679_vm0, %v3486_v27  ;;  %v1289_v29 = vpop.permute.xlu2 %1288 }
 0x20b   : > { %v1307_v12 = vpop.permute.xlu0 %1306 }
 0x20c   : > { %2394 = vmatpush.xpose.msk.msrb.mxu1 %vm679_vm0, %v1319_v34  ;;  %v1287_v28 = vpop.permute.xlu1 %1286 }
 0x210   : > { %2395 = vmatpush.xpose.msk.msrb.mxu1 %vm679_vm0, %v1317_v5  ;;  %2381 = vmatmul.msk.f32.gmra.mxu3 %vm679_vm0, %v3499_v36  ;;  %v1295_v33 = vpop.permute.xlu2 %1294 }
 0x213   : > { %v1279_v19 = vpop.permute.xlu0 %1278 }
 0x214   : > { %2396 = vmatpush.xpose.msk.msrb.mxu1 %vm679_vm0, %v1315_v6  ;;  %v1293_v30 = vpop.permute.xlu1 %1292 }
 0x218   : > { %2397 = vmatpush.xpose.msk.msrb.mxu1 %vm679_vm0, %v1313_v7  ;;  %2382 = vmatmul.msk.f32.gmra.mxu3 %vm679_vm0, %v3506_v45  ;;  %v1301_v36 = vpop.permute.xlu2 %1300 }
 0x21b   : > { %v1285_v27 = vpop.permute.xlu0 %1284 }
 0x21c   : > { %2398 = vmatpush.xpose.msk.msrb.mxu1 %vm679_vm0, %v1311_v9  ;;  %v1299_v11 = vpop.permute.xlu1 %1298 }
 0x220   : > { %2399 = vmatpush.xpose.msk.msrb.mxu1 %vm679_vm0, %v1309_v10  ;;  %2383 = vmatmul.msk.f32.gmra.mxu3 %vm679_vm0, %v3528_v52 }
 0x223   : > { %v1291_v31 = vpop.permute.xlu0 %1290 }
 0x224   : > { %2400 = vmatpush.xpose.msk.msrb.mxu1 %vm679_vm0, %v1307_v12  ;;  %v2588_v42 = vpop.permute.xlu2 %2587 }
 0x225   : > { %v2589_v45 = vunpack.i.l.bf16 %v2588_v42  ;;  %v2590_v51 = vunpack.i.h.bf16 %v2588_v42 }
 0x227   : > { %2401 = vmatmul.msk.f32.vlgmr.msrb.gmra.mxu1 %vm679_vm0, %v1275_v13 }
 0x228   : > { %2384 = vmatmul.msk.f32.gmra.mxu3 %vm679_vm0, %v675_v63 }
 0x22b   : > { %v1297_v35 = vpop.permute.xlu0 %1296 }
 0x22c   : > { %v2598_v39 = vpop.permute.xlu2 %2597 }
 0x22d   : > { %v2599_v26 = vunpack.i.l.bf16 %v2598_v39  ;;  %v2600_v55 = vunpack.i.h.bf16 %v2598_v39 }
 0x22f   : > { %2402 = vmatmul.msk.f32.gmra.mxu1 %vm679_vm0, %v1277_v14 }
 0x233   : > { %v793_v17 = vpop.f32.mrf.mxu3  ;;  %v1303_v38 = vpop.permute.xlu0 %1302 }
 0x234   : > { %v3605_v20 = vadd.f32 %v3602_v16, %v793_v17  ;;  %v1305_v37 = vpop.permute.xlu1 %1304 }
 0x236   : > { %841 = vmax.xlane.f32.xlu0 %v3605_v20 }
 0x237   : > { %2403 = vmatmul.msk.f32.gmra.mxu1 %vm679_vm0, %v1279_v19 }
 0x23b   : > { %v796_v21 = vpop.f32.mrf.mxu3  ;;  %v2593_v48 = vpop.permute.xlu0 %2592 }
 0x23c   : > { %v3610_v23 = vadd.f32 %v3602_v16, %v796_v21  ;;  %v2594_v52 = vunpack.i.l.bf16 %v2593_v48  ;;  %v2595_v43 = vunpack.i.h.bf16 %v2593_v48 }
 0x23e   : > { %843 = vmax.xlane.f32.xlu2 %v3610_v23 }
 0x23f   : > { %2404 = vmatmul.msk.f32.gmra.mxu1 %vm679_vm0, %v1281_v24 }
 0x243   : > { %v799_v15 = vpop.f32.mrf.mxu3 }
 0x244   : > { %v3629_v60 = vadd.f32 %v3602_v16, %v799_v15 }
 0x247   : > { %2405 = vmatmul.msk.f32.gmra.mxu1 %vm679_vm0, %v1283_v25 }
 0x24b   : > { %v3657_v46 = vpop.f32.mrf.mxu3 }
 0x24c   : > { %v2603_v40 = vpop.permute.xlu1 %2602  ;;  %v3716_v15 = vadd.f32 %v3602_v16, %v3657_v46 }
 0x24d   : > { %v2604_v41 = vunpack.i.l.bf16 %v2603_v40  ;;  %v2605_v44 = vunpack.i.h.bf16 %v2603_v40 }
 0x24f   : > { %2406 = vmatmul.msk.f32.gmra.mxu1 %vm679_vm0, %v1285_v27  ;;  %1900 = vmatpush.msrb.mxu2 %v2604_v41 }
 0x251   : > { %1901 = vmatpush.msrb.mxu2 %v2605_v44 }
 0x253   : > { %1902 = vmatpush.msrb.mxu2 %v2589_v45 }
 0x255   : > { %1903 = vmatpush.msrb.mxu2 %v2590_v51 }
 0x257   : > { %2407 = vmatmul.msk.f32.gmra.mxu1 %vm679_vm0, %v1287_v28  ;;  %1904 = vmatpush.msrb.mxu2 %v2594_v52 }
 0x259   : > { %1905 = vmatpush.msrb.mxu2 %v2595_v43 }
 0x25b   : > { %1906 = vmatpush.msrb.mxu2 %v2599_v26 }
 0x25d   : > { %1907 = vmatpush.msrb.mxu2 %v2600_v55 }
 0x25f   : > { %2408 = vmatmul.msk.f32.gmra.mxu1 %vm679_vm0, %v1289_v29 }
 0x267   : > { %2409 = vmatmul.msk.f32.gmra.mxu1 %vm679_vm0, %v1291_v31 }
 0x26f   : > { %2410 = vmatmul.msk.f32.gmra.mxu1 %vm679_vm0, %v1293_v30 }
 0x277   : > { %2411 = vmatmul.msk.f32.gmra.mxu1 %vm679_vm0, %v1295_v33 }
 0x27f   : > { %2412 = vmatmul.msk.f32.gmra.mxu1 %vm679_vm0, %v1297_v35 }
 0x287   : > { %2413 = vmatmul.msk.f32.gmra.mxu1 %vm679_vm0, %v1299_v11 }
 0x28f   : > { %2414 = vmatmul.msk.f32.gmra.mxu1 %vm679_vm0, %v1301_v36 }
 0x297   : > { %2415 = vmatmul.msk.f32.gmra.mxu1 %vm679_vm0, %v1303_v38 }
 0x29f   : > { %2416 = vmatmul.msk.f32.gmra.mxu1 %vm679_vm0, %v1305_v37 }
 0x2a4   : > { %v1419_v57 = vpop.f32.mrf.mxu1 }
 0x2a5   : > { %v1420_v22 = vadd.f32 %v3602_v16, %v1419_v57 }
 0x2a7   : > { %1467 = vmax.xlane.f32.xlu2 %v1420_v22 }
 0x2ac   : > { %v1422_v18 = vpop.f32.mrf.mxu1 }
 0x2ad   : > { %v1423_v59 = vadd.f32 %v3602_v16, %v1422_v18 }
 0x2af   : > { %845 = vmax.xlane.f32.xlu2 %v3629_v60  ;;  %1469 = vmax.xlane.f32.xlu0 %v1423_v59 }
 0x2b1   : > { %v3675_v7 = vpop.xlane.xlu2 %843 }
 0x2b4   : > { %v1425_v62 = vpop.f32.mrf.mxu1 }
 0x2b5   : > { %v1426_v63 = vadd.f32 %v3602_v16, %v1425_v62 }
 0x2b7   : > { %1471 = vmax.xlane.f32.xlu1 %v1426_v63 }
 0x2bc   : > { %v1428_v0 = vpop.f32.mrf.mxu1 }
 0x2bd   : > { %v3649_v50 = vadd.f32 %v3602_v16, %v1428_v0 }
 0x2c3   : > { %2612 = vrot.lane.b32.xlu0 %v2611_v4, %s3036_s30  ;;  %v805_v4 = vpop.f32.mrf.mxu3 }
 0x2c4   : > { %v1431_v1 = vpop.f32.mrf.mxu1  ;;  %v3672_v6 = vadd.f32 %v3602_v16, %v805_v4 }
 0x2c5   : > { %v3660_v47 = vadd.f32 %v3602_v16, %v1431_v1 }
 0x2c7   : > { %2617 = vrot.lane.b32.xlu2 %v2616_v61, %s3036_s30 }
 0x2cb   : > { %v808_v11 = vpop.f32.mrf.mxu3 }
 0x2cc   : > { %v1434_v2 = vpop.f32.mrf.mxu1  ;;  %v3700_v37 = vadd.f32 %v3602_v16, %v808_v11 }
 0x2cd   : > { %v3646_v34 = vadd.f32 %v3602_v16, %v1434_v2 }
 0x2d0   : > { %2607 = vrot.lane.b32.xlu1 %v2606_v8, %s3036_s30  ;;  %v3677_v8 = vpop.xlane.xlu0 %841 }
 0x2d1   : > { %v873_v18 = vsub.f32 %v3605_v20, %v3677_v8  ;;  %v874_v20 = vsub.f32 %v3610_v23, %v3675_v7 }
 0x2d3   : > { %v811_v0 = vpop.f32.mrf.mxu3  ;;  %v891_v46 = vmul.f32 1.442695, %v874_v20 }
 0x2d4   : > { %v1437_v3 = vpop.f32.mrf.mxu1 }
 0x2d5   : > { %v3654_v49 = vadd.f32 %v3602_v16, %v1437_v3 }
 0x2db   : > { %v814_v23 = vpop.f32.mrf.mxu3 }
 0x2dc   : > { %v1440_v5 = vpop.f32.mrf.mxu1 }
 0x2dd   : > { %v3667_v61 = vadd.f32 %v3602_v16, %v1440_v5 }
 0x2e4   : > { %v1443_v53 = vpop.f32.mrf.mxu1 }
 0x2e5   : > { %v3663_v54 = vadd.f32 %v3602_v16, %v1443_v53 }
 0x2ec   : > { %v1446_v21 = vpop.f32.mrf.mxu1 }
 0x2ed   : > { %1477 = vmax.xlane.f32.xlu0 %v3646_v34  ;;  %v3683_v25 = vadd.f32 %v3602_v16, %v1446_v21 }
 0x2f0   : > { %1473 = vmax.xlane.f32.xlu2 %v3649_v50 }
 0x2f4   : > { %v1449_v30 = vpop.f32.mrf.mxu1 }
 0x2f5   : > { %1479 = vmax.xlane.f32.xlu0 %v3654_v49  ;;  %v3690_v31 = vadd.f32 %v3602_v16, %v1449_v30 }
 0x2f8   : > { %1475 = vmax.xlane.f32.xlu2 %v3660_v47 }
 0x2fa   : > { %1483 = vmax.xlane.f32.xlu1 %v3663_v54 }
 0x2fc   : > { %v1452_v35 = vpop.f32.mrf.mxu1 }
 0x2fd   : > { %1481 = vmax.xlane.f32.xlu0 %v3667_v61  ;;  %v3697_v36 = vadd.f32 %v3602_v16, %v1452_v35 }
 0x304   : > { %v1455_v62 = vpop.f32.mrf.mxu1 }
 0x305   : > { %849 = vmax.xlane.f32.xlu0 %v3672_v6  ;;  %v3724_v3 = vadd.f32 %v3602_v16, %v1455_v62 }
 0x30c   : > { %v1458_v53 = vpop.f32.mrf.mxu1 }
 0x31a   : > { %v1468_v9 = vpop.xlane.xlu2 %1467 }
 0x31b   : > { %v1499_v10 = vsub.f32 %v1420_v22, %v1468_v9 }
 0x31d   : > { %v1515_v12 = vmul.f32 1.442695, %v1499_v10  ;;  %v3742_v10 = vadd.f32 %v3602_v16, %v1458_v53 }
 0x31f   : > { %2638 = vpow2.f32 %v1515_v12 }
 0x322   : > { %v1470_v13 = vpop.xlane.xlu0 %1469  ;;  %v3702_v38 = vpop.xlane.xlu2 %845 }
 0x323   : > { %v1500_v14 = vsub.f32 %v1423_v59, %v1470_v13  ;;  %v3751_v13 = vadd.f32 %v3602_v16, %v814_v23 }
 0x325   : > { %v3679_v17 = vpop.eup %2638  ;;  %v1517_v19 = vmul.f32 1.442695, %v1500_v14 }
 0x326   : > { %1547 = vadd.xlane.f32.xlu1 %v3679_v17 }
 0x327   : > { %2640 = vpow2.f32 %v1517_v19 }
 0x32a   : > { %v1472_v24 = vpop.xlane.xlu1 %1471  ;;  %v2618_v48 = vpop.permute.xlu2 %2617 }
 0x32b   : > { %v1501_v27 = vsub.f32 %v1426_v63, %v1472_v24  ;;  %v2619_v52 = vunpack.i.l.bf16 %v2618_v48  ;;  %v2620_v43 = vunpack.i.h.bf16 %v2618_v48  ;;  %v889_v63 = vmul.f32 1.442695, %v873_v18 }
 0x32d   : > { %v1519_v28 = vmul.f32 1.442695, %v1501_v27  ;;  %v3685_v29 = vpop.eup %2640 }
 0x32e   : > { %1485 = vmax.xlane.f32.xlu1 %v3683_v25  ;;  %1549 = vadd.xlane.f32.xlu2 %v3685_v29 }
 0x32f   : > { %2642 = vpow2.f32 %v1519_v28 }
 0x335   : > { %v3692_v33 = vpop.eup %2642  ;;  %v2613_v42 = vpop.permute.xlu0 %2612 }
 0x336   : > { %1487 = vmax.xlane.f32.xlu1 %v3690_v31  ;;  %1551 = vadd.xlane.f32.xlu0 %v3692_v33  ;;  %v2614_v45 = vunpack.i.l.bf16 %v2613_v42  ;;  %v2615_v51 = vunpack.i.h.bf16 %v2613_v42 }
 0x33e   : > { %851 = vmax.xlane.f32.xlu1 %v3700_v37  ;;  %1489 = vmax.xlane.f32.xlu0 %v3697_v36 }
 0x342   : > { %v2608_v40 = vpop.permute.xlu1 %2607 }
 0x343   : > { %v2609_v41 = vunpack.i.l.bf16 %v2608_v40  ;;  %v2610_v44 = vunpack.i.h.bf16 %v2608_v40 }
 0x345   : > { %1908 = vmatpush.msrb.mxu2 %v2609_v41 }
 0x346   : > { %2622 = vrot.lane.b32.xlu2 %v2621_v58, %s3036_s30 }
 0x347   : > { %1909 = vmatpush.msrb.mxu2 %v2610_v44 }
 0x349   : > { %1910 = vmatpush.msrb.mxu2 %v2614_v45 }
 0x34b   : > { %1911 = vmatpush.msrb.mxu2 %v2615_v51 }
 0x34d   : > { %1912 = vmatpush.msrb.mxu2 %v2619_v52 }
 0x34f   : > { %1913 = vmatpush.msrb.mxu2 %v2620_v43 }
 0x360   : > { %v1478_v57 = vpop.xlane.xlu0 %1477 }
 0x361   : > { %v1504_v59 = vsub.f32 %v3646_v34, %v1478_v57 }
 0x363   : > { %v1474_v39 = vpop.xlane.xlu2 %1473  ;;  %v1525_v2 = vmul.f32 1.442695, %v1504_v59 }
 0x364   : > { %v1502_v26 = vsub.f32 %v3649_v50, %v1474_v39  ;;  %v3729_v50 = vadd.f32 %v3602_v16, %v811_v0 }
 0x366   : > { %v1521_v55 = vmul.f32 1.442695, %v1502_v26 }
 0x368   : > { %2644 = vpow2.f32 %v1521_v55  ;;  %v1480_v1 = vpop.xlane.xlu0 %1479 }
 0x369   : > { %v1505_v34 = vsub.f32 %v3654_v49, %v1480_v1  ;;  %v875_v49 = vsub.f32 %v3629_v60, %v3702_v38  ;;  %v817_v60 = vpop.f32.mrf.mxu3 }
 0x36a   : > { %v3762_v28 = vadd.f32 %v3602_v16, %v817_v60 }
 0x36b   : > { %v1476_v22 = vpop.xlane.xlu2 %1475  ;;  %v1527_v4 = vmul.f32 1.442695, %v1505_v34  ;;  %v893_v14 = vmul.f32 1.442695, %v875_v49 }
 0x36c   : > { %v1503_v32 = vsub.f32 %v3660_v47, %v1476_v22 }
 0x36d   : > { %v1484_v19 = vpop.xlane.xlu1 %1483 }
 0x36e   : > { %v3712_v56 = vpop.eup %2644  ;;  %v1523_v58 = vmul.f32 1.442695, %v1503_v32 }
 0x36f   : > { %1553 = vadd.xlane.f32.xlu1 %v3712_v56  ;;  %847 = vmax.xlane.f32.xlu2 %v3716_v15 }
 0x370   : > { %2646 = vpow2.f32 %v1523_v58  ;;  %v1482_v8 = vpop.xlane.xlu0 %1481 }
 0x371   : > { %2648 = vpow2.f32 %v889_v63  ;;  %v1506_v7 = vsub.f32 %v3667_v61, %v1482_v8  ;;  %v1507_v61 = vsub.f32 %v3663_v54, %v1484_v19  ;;  %v1461_v54 = vpop.f32.mrf.mxu1  ;;  %v820_v35 = vpop.f32.mrf.mxu3 }
 0x372   : > { %2650 = vpow2.f32 %v1525_v2  ;;  %v3772_v40 = vadd.f32 %v3602_v16, %v1461_v54  ;;  %v3777_v42 = vadd.f32 %v3602_v16, %v820_v35 }
 0x373   : > { %2652 = vpow2.f32 %v891_v46  ;;  %v1529_v12 = vmul.f32 1.442695, %v1506_v7  ;;  %v1531_v27 = vmul.f32 1.442695, %v1507_v61 }
 0x374   : > { %2654 = vpow2.f32 %v1527_v4 }
 0x375   : > { %2656 = vpow2.f32 %v1529_v12 }
 0x376   : > { %v3726_v5 = vpop.eup %2646  ;;  %2658 = vpow2.f32 %v893_v14 }
 0x377   : > { %1491 = vmax.xlane.f32.xlu1 %v3724_v3  ;;  %1555 = vadd.xlane.f32.xlu0 %v3726_v5  ;;  %v3737_v47 = vpop.eup %2648  ;;  %2660 = vpow2.f32 %v1531_v27 }
 0x378   : > { %853 = vmax.xlane.f32.xlu2 %v3729_v50  ;;  %v3739_v9 = vpop.eup %2650  ;;  %v850_v38 = vpop.xlane.xlu0 %849 }
 0x379   : > { %v3753_v21 = vpop.eup %2652  ;;  %v877_v44 = vsub.f32 %v3672_v6, %v850_v38  ;;  %v1464_v45 = vpop.f32.mrf.mxu1 }
 0x37a   : > { %v3755_v24 = vpop.eup %2654  ;;  %v3784_v51 = vadd.f32 %v3602_v16, %v1464_v45 }
 0x37b   : > { %v3764_v30 = vpop.eup %2656  ;;  %v897_v52 = vmul.f32 1.442695, %v877_v44 }
 0x37c   : > { %v3766_v11 = vpop.eup %2658 }
 0x37d   : > { %v3774_v41 = vpop.eup %2660 }
 0x37f   : > { %921 = vadd.xlane.f32.xlu0 %v3737_v47  ;;  %1557 = vadd.xlane.f32.xlu1 %v3739_v9 }
 0x380   : > { %1493 = vmax.xlane.f32.xlu2 %v3742_v10 }
 0x387   : > { %855 = vmax.xlane.f32.xlu0 %v3751_v13  ;;  %923 = vadd.xlane.f32.xlu1 %v3753_v21 }
 0x388   : > { %1559 = vadd.xlane.f32.xlu2 %v3755_v24 }
 0x38f   : > { %857 = vmax.xlane.f32.xlu1 %v3762_v28  ;;  %1561 = vadd.xlane.f32.xlu0 %v3764_v30 }
 0x390   : > { %925 = vadd.xlane.f32.xlu2 %v3766_v11 }
 0x397   : > { %1563 = vadd.xlane.f32.xlu1 %v3774_v41  ;;  %1495 = vmax.xlane.f32.xlu0 %v3772_v40 }
 0x398   : > { %859 = vmax.xlane.f32.xlu2 %v3777_v42 }
 0x399   : > { %v1548_v48 = vpop.xlane.xlu1 %1547 }
 0x39a   : > { %2662 = vrcp.f32 %v1548_v48  ;;  %v1590_v22 = vand.u32 2147483648, %v1548_v48  ;;  %v1588_v18 = vand.u32 2147483647, %v1548_v48  ;;  %vm1584_vm2 = vweird.f32 %v1548_v48 }
 0x39b   : > { %2664 = vpow2.f32 %v897_v52 }
 0x39c   : > { %v1591_v63 = vor.u32 1.1754944e-38, %v1590_v22  ;;  %vm1589_vm4 = vcmp.eq.f32.partialorder %v1588_v18, 8.507059e+37 }
 0x39f   : > { %1497 = vmax.xlane.f32.xlu1 %v3784_v51 }
 0x3a0   : > { %v2663_v43 = vpop.eup %2662 }
 0x3a1   : > { %v1580_v39 = vmul.f32 %v2663_v43, %v1548_v48  ;;  %v1486_v26 = vpop.xlane.xlu1 %1485  ;;  %v1550_v57 = vpop.xlane.xlu2 %1549  ;;  %vm1585_vm1 = vweird.f32 %v2663_v43 }
 0x3a2   : > { %v1508_v55 = vsub.f32 %v3683_v25, %v1486_v26  ;;  %2666 = vrcp.f32 %v1550_v57  ;;  %v3788_v59 = vpop.eup %2664  ;;  %vm1586_vm3 = vmor %vm1584_vm2, %vm1585_vm1  ;;  %v1604_v14 = vand.u32 2147483648, %v1550_v57  ;;  %v1602_v19 = vand.u32 2147483647, %v1550_v57 }
 0x3a3   : > { %v1581_v6 = vsub.f32 1.0, %v1580_v39  ;;  %vm1598_vm6 = vweird.f32 %v1550_v57 }
 0x3a4   : > { %v1533_v32 = vmul.f32 1.442695, %v1508_v55  ;;  %v1605_v35 = vor.u32 1.1754944e-38, %v1604_v14  ;;  %vm1603_vm8 = vcmp.eq.f32.partialorder %v1602_v19, 8.507059e+37 }
 0x3a5   : > { %v1582_v58 = vmul.f32 %v2663_v43, %v1581_v6 }
 0x3a6   : > { %2668 = vpow2.f32 %v1533_v32 }
 0x3a7   : > { %929 = vadd.xlane.f32.xlu1 %v3788_v59  ;;  %v1583_v62 = vadd.f32 %v2663_v43, %v1582_v58 }
 0x3a8   : > { %v2667_v0 = vpop.eup %2666 }
 0x3a9   : > { %v1488_v25 = vpop.xlane.xlu1 %1487  ;;  %v1552_v1 = vpop.xlane.xlu0 %1551  ;;  %v1587_v2 = vsel %vm1586_vm3, %v2663_v43, %v1583_v62  ;;  %v1594_v20 = vmul.f32 %v2667_v0, %v1550_v57  ;;  %vm1599_vm5 = vweird.f32 %v2667_v0 }
 0x3aa   : > { %v1509_v34 = vsub.f32 %v3690_v31, %v1488_v25  ;;  %v2623_v53 = vpop.permute.xlu2 %2622  ;;  %2670 = vrcp.f32 %v1552_v1  ;;  %v1592_v46 = vsel %vm1589_vm4, %v1591_v63, %v1587_v2  ;;  %vm1600_vm7 = vmor %vm1598_vm6, %vm1599_vm5  ;;  %v1618_v57 = vand.u32 2147483648, %v1552_v1 }
 0x3ab   : > { %v2624_v4 = vunpack.i.l.bf16 %v2623_v53  ;;  %v1803_v8 = vmul.f32 %v3679_v17, %v1592_v46  ;;  %v1595_v7 = vsub.f32 1.0, %v1594_v20  ;;  %v2625_v12 = vunpack.i.h.bf16 %v2623_v53 }
 0x3ac   : > { %v3794_v23 = vpop.eup %2668  ;;  %v1535_v49 = vmul.f32 1.442695, %v1509_v34  ;;  %v1616_v22 = vand.u32 2147483647, %v1552_v1  ;;  %vm1612_vm10 = vweird.f32 %v1552_v1 }
 0x3ad   : > { %1914 = vmatpush.msrb.mxu2 %v2624_v4  ;;  %1565 = vadd.xlane.f32.xlu2 %v3794_v23  ;;  %2417 = vst [vmem:[%s3797_s17 + $0x80] sm:$0xff] %v1803_v8  ;;  %v1596_v31 = vmul.f32 %v2667_v0, %v1595_v7 }
 0x3ae   : > { %2672 = vpow2.f32 %v1535_v49  ;;  %vm1617_vm12 = vcmp.eq.f32.partialorder %v1616_v22, 8.507059e+37 }
 0x3af   : > { %1915 = vmatpush.msrb.mxu2 %v2625_v12  ;;  %v1597_v17 = vadd.f32 %v2667_v0, %v1596_v31 }
 0x3b0   : > { %v2671_v61 = vpop.eup %2670  ;;  %1916 = vmatmul.f32.vlgmr.msrb.gmra.mxu2 %v1803_v8 }
 0x3b1   : > { %v1608_v60 = vmul.f32 %v2671_v61, %v1552_v1  ;;  %v852_v27 = vpop.xlane.xlu1 %851  ;;  %v1490_v54 = vpop.xlane.xlu0 %1489  ;;  %v1601_v45 = vsel %vm1600_vm7, %v2667_v0, %v1597_v17  ;;  %vm1613_vm9 = vweird.f32 %v2671_v61 }
 0x3b2   : > { %v878_v38 = vsub.f32 %v3700_v37, %v852_v27  ;;  %v1510_v44 = vsub.f32 %v3697_v36, %v1490_v54  ;;  %v1606_v52 = vsel %vm1603_vm8, %v1605_v35, %v1601_v45  ;;  %vm1614_vm11 = vmor %vm1612_vm10, %vm1613_vm9  ;;  %v1619_v37 = vor.u32 1.1754944e-38, %v1618_v57  ;;  %v823_v1 = vpop.f32.mrf.mxu3 }
 0x3b3   : > { %v1609_v48 = vsub.f32 1.0, %v1608_v60  ;;  %v1804_v55 = vmul.f32 %v3685_v29, %v1606_v52 }
 0x3b4   : > { %v3802_v43 = vpop.eup %2672  ;;  %v899_v39 = vmul.f32 1.442695, %v878_v38  ;;  %v1537_v26 = vmul.f32 1.442695, %v1510_v44 }
 0x3b5   : > { %v1610_v6 = vmul.f32 %v2671_v61, %v1609_v48  ;;  %1567 = vadd.xlane.f32.xlu2 %v3802_v43  ;;  %2418 = vst [vmem:[%s3797_s17 + $0x88] sm:$0xff] %v1804_v55 }
 0x3b6   : > { %2674 = vpow2.f32 %v899_v39 }
 0x3b7   : > { %2676 = vpow2.f32 %v1537_v26  ;;  %v1611_v36 = vadd.f32 %v2671_v61, %v1610_v6  ;;  %v3832_v26 = vadd.f32 %v3602_v16, %v823_v1 }
 0x3b8   : > { %1919 = vmatmul.f32.gmra.mxu2 %v1804_v55 }
 0x3b9   : > { %v1615_v32 = vsel %vm1614_vm11, %v2671_v61, %v1611_v36 }
 0x3ba   : > { %v1620_v58 = vsel %vm1617_vm12, %v1619_v37, %v1615_v32  ;;  %v826_v61 = vpop.f32.mrf.mxu3 }
 0x3bb   : > { %v1805_v29 = vmul.f32 %v3692_v33, %v1620_v58  ;;  %v3843_v37 = vadd.f32 %v3602_v16, %v826_v61 }
 0x3bc   : > { %v3808_v18 = vpop.eup %2674 }
 0x3bd   : > { %v3810_v62 = vpop.eup %2676  ;;  %931 = vadd.xlane.f32.xlu1 %v3808_v18  ;;  %2419 = vst [vmem:[%s3797_s17 + $0x90] sm:$0xff] %v1805_v29 }
 0x3be   : > { %1569 = vadd.xlane.f32.xlu2 %v3810_v62 }
 0x3c0   : > { %1922 = vmatmul.f32.gmra.mxu2 %v1805_v29 }
 0x3c2   : > { %v829_v32 = vpop.f32.mrf.mxu3 }
 0x3e2   : > { %v1554_v63 = vpop.xlane.xlu1 %1553  ;;  %v848_v0 = vpop.xlane.xlu2 %847 }
 0x3e3   : > { %2678 = vrcp.f32 %v1554_v63  ;;  %v876_v25 = vsub.f32 %v3716_v15, %v848_v0  ;;  %v1632_v12 = vand.u32 2147483648, %v1554_v63  ;;  %v1630_v19 = vand.u32 2147483647, %v1554_v63 }
 0x3e4   : > { %vm1626_vm14 = vweird.f32 %v1554_v63 }
 0x3e5   : > { %v895_v2 = vmul.f32 1.442695, %v876_v25  ;;  %v1633_v60 = vor.u32 1.1754944e-38, %v1632_v12  ;;  %vm1631_vm1 = vcmp.eq.f32.partialorder %v1630_v19, 8.507059e+37  ;;  %v3863_v19 = vadd.f32 %v3602_v16, %v829_v32 }
 0x3e7   : > { %2680 = vpow2.f32 %v895_v2 }
 0x3e9   : > { %v2679_v20 = vpop.eup %2678 }
 0x3ea   : > { %v1622_v33 = vmul.f32 %v2679_v20, %v1554_v63  ;;  %v1492_v34 = vpop.xlane.xlu1 %1491  ;;  %v1556_v53 = vpop.xlane.xlu0 %1555  ;;  %vm1627_vm13 = vweird.f32 %v2679_v20 }
 0x3eb   : > { %v1511_v46 = vsub.f32 %v3724_v3, %v1492_v34  ;;  %v854_v4 = vpop.xlane.xlu2 %853  ;;  %2682 = vrcp.f32 %v1556_v53  ;;  %vm1628_vm15 = vmor %vm1626_vm14, %vm1627_vm13  ;;  %v1646_v55 = vand.u32 2147483648, %v1556_v53  ;;  %vm1640_vm3 = vweird.f32 %v1556_v53 }
 0x3ec   : > { %v1623_v8 = vsub.f32 1.0, %v1622_v33  ;;  %v879_v7 = vsub.f32 %v3729_v50, %v854_v4 }
 0x3ed   : > { %v1539_v49 = vmul.f32 1.442695, %v1511_v46  ;;  %v3818_v14 = vpop.eup %2680  ;;  %v1647_v58 = vor.u32 1.1754944e-38, %v1646_v55 }
 0x3ee   : > { %v1624_v31 = vmul.f32 %v2679_v20, %v1623_v8  ;;  %v901_v15 = vmul.f32 1.442695, %v879_v7  ;;  %927 = vadd.xlane.f32.xlu0 %v3818_v14 }
 0x3ef   : > { %2684 = vpow2.f32 %v1539_v49 }
 0x3f0   : > { %2686 = vpow2.f32 %v901_v15  ;;  %v1625_v17 = vadd.f32 %v2679_v20, %v1624_v31 }
 0x3f1   : > { %v2683_v3 = vpop.eup %2682 }
 0x3f2   : > { %v1636_v27 = vmul.f32 %v2683_v3, %v1556_v53  ;;  %v3821_v50 = vpop.xlane.xlu1 %1557  ;;  %v3823_v54 = vpop.xlane.xlu0 %921  ;;  %v1629_v35 = vsel %vm1628_vm15, %v2679_v20, %v1625_v17  ;;  %vm1641_vm2 = vweird.f32 %v2683_v3 }
 0x3f3   : > { %v1494_v38 = vpop.xlane.xlu2 %1493  ;;  %2688 = vrcp.f32 %v3821_v50  ;;  %v1634_v44 = vsel %vm1631_vm1, %v1633_v60, %v1629_v35  ;;  %vm1642_vm4 = vmor %vm1640_vm3, %vm1641_vm2  ;;  %v964_v0 = vand.u32 2147483648, %v3823_v54  ;;  %v962_v8 = vand.u32 2147483647, %v3823_v54 }
 0x3f4   : > { %v1637_v45 = vsub.f32 1.0, %v1636_v27  ;;  %v1512_v48 = vsub.f32 %v3742_v10, %v1494_v38  ;;  %2690 = vrcp.f32 %v3823_v54  ;;  %v1806_v52 = vmul.f32 %v3712_v56, %v1634_v44 }
 0x3f5   : > { %v3829_v39 = vpop.eup %2684  ;;  %v1644_v10 = vand.u32 2147483647, %v1556_v53  ;;  %v1658_v12 = vand.u32 2147483647, %v3821_v50  ;;  %v1660_v31 = vand.u32 2147483648, %v3821_v50  ;;  %vm958_vm7 = vweird.f32 %v3823_v54 }
 0x3f6   : > { %v3834_v57 = vpop.eup %2686  ;;  %v1638_v6 = vmul.f32 %v2683_v3, %v1637_v45  ;;  %v1541_v22 = vmul.f32 1.442695, %v1512_v48  ;;  %1571 = vadd.xlane.f32.xlu2 %v3829_v39  ;;  %2420 = vst [vmem:[%s3797_s17 + $0x98] sm:$0xff] %v1806_v52  ;;  %1925 = vmatmul.f32.gmra.mxu2 %v1806_v52  ;;  %v965_v61 = vor.u32 1.1754944e-38, %v964_v0  ;;  %vm3871_vm9 = vcmp.eq.f32.partialorder %v962_v8, 8.507059e+37 }
 0x3f7   : > { %861 = vmax.xlane.f32.xlu0 %v3832_v26  ;;  %933 = vadd.xlane.f32.xlu1 %v3834_v57  ;;  %vm1645_vm5 = vcmp.eq.f32.partialorder %v1644_v10, 8.507059e+37  ;;  %vm1654_vm10 = vweird.f32 %v3821_v50  ;;  %vm3883_vm12 = vcmp.eq.f32.partialorder %v1658_v12, 8.507059e+37  ;;  %v1661_v44 = vor.u32 1.1754944e-38, %v1660_v31 }
 0x3f8   : > { %2692 = vpow2.f32 %v1541_v22  ;;  %v1639_v56 = vadd.f32 %v2683_v3, %v1638_v6 }
 0x3f9   : > { %v3840_v36 = vpop.eup %2688 }
 0x3fa   : > { %v2691_v29 = vpop.eup %2690  ;;  %v1650_v63 = vmul.f32 %v3840_v36, %v3821_v50  ;;  %v3848_v25 = vpop.xlane.xlu1 %923  ;;  %v1643_v2 = vsel %vm1642_vm4, %v2683_v3, %v1639_v56  ;;  %vm1655_vm6 = vweird.f32 %v3840_v36 }
 0x3fb   : > { %v856_v1 = vpop.xlane.xlu0 %855  ;;  %v954_v20 = vmul.f32 %v2691_v29, %v3823_v54  ;;  %2694 = vrcp.f32 %v3848_v25  ;;  %v3852_v33 = vpop.xlane.xlu2 %1559  ;;  %v1648_v53 = vsel %vm1645_vm5, %v1647_v58, %v1643_v2  ;;  %vm959_vm8 = vweird.f32 %v2691_v29  ;;  %vm3879_vm11 = vmor %vm1654_vm10, %vm1655_vm6 }
 0x3fc   : > { %v880_v34 = vsub.f32 %v3751_v13, %v856_v1  ;;  %v1651_v46 = vsub.f32 1.0, %v1650_v63  ;;  %2696 = vrcp.f32 %v3852_v33  ;;  %v1807_v4 = vmul.f32 %v3726_v5, %v1648_v53  ;;  %vm960_vm13 = vmor %vm958_vm7, %vm959_vm8  ;;  %v832_v54 = vpop.f32.mrf.mxu3 }
 0x3fd   : > { %v955_v7 = vsub.f32 1.0, %v954_v20  ;;  %v976_v45 = vand.u32 2147483647, %v3848_v25  ;;  %v978_v22 = vand.u32 2147483648, %v3848_v25  ;;  %v1672_v10 = vand.u32 2147483647, %v3852_v33 }
 0x3fe   : > { %v903_v49 = vmul.f32 1.442695, %v880_v34  ;;  %v3860_v15 = vpop.eup %2692  ;;  %v1652_v13 = vmul.f32 %v3840_v36, %v1651_v46  ;;  %2421 = vst [vmem:[%s3797_s17 + $0xa0] sm:$0xff] %v1807_v4  ;;  %1928 = vmatmul.f32.gmra.mxu2 %v1807_v4  ;;  %v1674_v46 = vand.u32 2147483648, %v3852_v33  ;;  %v3922_v4 = vadd.f32 %v3602_v16, %v832_v54 }
 0x3ff   : > { %v956_v5 = vmul.f32 %v2691_v29, %v955_v7  ;;  %863 = vmax.xlane.f32.xlu0 %v3843_v37  ;;  %1573 = vadd.xlane.f32.xlu2 %v3860_v15  ;;  %vm972_vm15 = vweird.f32 %v3848_v25  ;;  %vm3930_vm1 = vcmp.eq.f32.partialorder %v976_v45, 8.507059e+37  ;;  %vm1668_vm2 = vweird.f32 %v3852_v33  ;;  %v2766_v7 = vld [vmem:[%s336_s20] ss:$0 sm:$0xff] }
 0x400   : > { %2698 = vpow2.f32 %v903_v49  ;;  %v1653_v3 = vadd.f32 %v3840_v36, %v1652_v13  ;;  %v979_v49 = vor.u32 1.1754944e-38, %v978_v22  ;;  %vm3945_vm5 = vcmp.eq.f32.partialorder %v1672_v10, 8.507059e+37 }
 0x401   : > { %v3877_v60 = vpop.eup %2694  ;;  %v957_v27 = vadd.f32 %v2691_v29, %v956_v5 }
 0x402   : > { %v3888_v48 = vpop.eup %2696  ;;  %v968_v52 = vmul.f32 %v3877_v60, %v3848_v25  ;;  %v858_v50 = vpop.xlane.xlu1 %857  ;;  %v1657_v6 = vsel %vm3879_vm11, %v3840_v36, %v1653_v3  ;;  %vm973_vm14 = vweird.f32 %v3877_v60  ;;  %v1675_v3 = vor.u32 1.1754944e-38, %v1674_v46 }
 0x403   : > { %v3892_v55 = vpop.xlane.xlu0 %1561  ;;  %v1664_v56 = vmul.f32 %v3888_v48, %v3852_v33  ;;  %v881_v32 = vsub.f32 %v3762_v28, %v858_v50  ;;  %v3905_v58 = vpop.xlane.xlu2 %925  ;;  %v961_v63 = vsel %vm960_vm13, %v2691_v29, %v957_v27  ;;  %v1662_v1 = vsel %vm3883_vm12, %v1661_v44, %v1657_v6  ;;  %vm3939_vm3 = vmor %vm972_vm15, %vm973_vm14 }
 0x404   : > { %2700 = vrcp.f32 %v3892_v55  ;;  %v969_v0 = vsub.f32 1.0, %v968_v52  ;;  %v966_v36 = vsel %vm3871_vm9, %v965_v61, %v961_v63  ;;  %v1808_v29 = vmul.f32 %v3739_v9, %v1662_v1 }
 0x405   : > { %2702 = vrcp.f32 %v3905_v58  ;;  %v1665_v28 = vsub.f32 1.0, %v1664_v56  ;;  %v905_v20 = vmul.f32 1.442695, %v881_v32  ;;  %v1177_v34 = vmul.f32 %v3737_v47, %v966_v36 }
 0x406   : > { %v3913_v2 = vpop.eup %2698  ;;  %v970_v53 = vmul.f32 %v3877_v60, %v969_v0  ;;  %2422 = vst [vmem:[%s3797_s17 + $0xa8] sm:$0xff] %v1808_v29  ;;  %1931 = vmatmul.f32.gmra.mxu2 %v1808_v29  ;;  %vm1669_vm4 = vweird.f32 %v3888_v48  ;;  %v992_v27 = vand.u32 2147483648, %v3905_v58  ;;  %v1686_v44 = vand.u32 2147483647, %v3892_v55 }
 0x407   : > { %935 = vadd.xlane.f32.xlu1 %v3913_v2  ;;  %v1666_v8 = vmul.f32 %v3888_v48, %v1665_v28  ;;  %2704 = vpow2.f32 %v905_v20  ;;  %865 = vmax.xlane.f32.xlu0 %v3863_v19  ;;  %1193 = vst [vmem:[%s3797_s17] sm:$0xff] %v1177_v34  ;;  %v1688_v45 = vand.u32 2147483648, %v3892_v55  ;;  %vm1670_vm6 = vmor %vm1668_vm2, %vm1669_vm4  ;;  %vm1682_vm9 = vweird.f32 %v3892_v55  ;;  %v835_v28 = vpop.f32.mrf.mxu3 }
 0x408   : > { %1225 = vmatmul.f32.vlgmr.msrb.gmra.mxu0 %v1177_v34  ;;  %v971_v47 = vadd.f32 %v3877_v60, %v970_v53  ;;  %vm986_vm10 = vweird.f32 %v3905_v58  ;;  %v993_v29 = vor.u32 1.1754944e-38, %v992_v27  ;;  %vm1687_vm13 = vcmp.eq.f32.partialorder %v1686_v44, 8.507059e+37 }
 0x409   : > { %v1667_v12 = vadd.f32 %v3888_v48, %v1666_v8 }
 0x40a   : > { %v3935_v16 = vpop.eup %2700  ;;  %v3951_v5 = vpop.xlane.xlu1 %1563  ;;  %v975_v17 = vsel %vm3939_vm3, %v3877_v60, %v971_v47 }
 0x40b   : > { %v2703_v31 = vpop.eup %2702  ;;  %v1678_v13 = vmul.f32 %v3935_v16, %v3892_v55  ;;  %v1496_v61 = vpop.xlane.xlu0 %1495  ;;  %2706 = vrcp.f32 %v3951_v5  ;;  %v980_v60 = vsel %vm3930_vm1, %v979_v49, %v975_v17  ;;  %v1671_v32 = vsel %vm1670_vm6, %v3888_v48, %v1667_v12 }
 0x40c   : > { %v982_v35 = vmul.f32 %v2703_v31, %v3905_v58  ;;  %v860_v38 = vpop.xlane.xlu2 %859  ;;  %v1513_v6 = vsub.f32 %v3772_v40, %v1496_v61  ;;  %v1178_v56 = vmul.f32 %v3753_v21, %v980_v60  ;;  %vm1683_vm7 = vweird.f32 %v3935_v16 }
 0x40d   : > { %v1679_v52 = vsub.f32 1.0, %v1678_v13  ;;  %v882_v50 = vsub.f32 %v3777_v42, %v860_v38  ;;  %v3969_v22 = vpop.eup %2704  ;;  %v1676_v33 = vsel %vm3945_vm5, %v1675_v3, %v1671_v32  ;;  %vm987_vm8 = vweird.f32 %v2703_v31  ;;  %vm1684_vm11 = vmor %vm1682_vm9, %vm1683_vm7 }
 0x40e   : > { %v983_v10 = vsub.f32 1.0, %v982_v35  ;;  %v1543_v63 = vmul.f32 1.442695, %v1513_v6  ;;  %1194 = vst [vmem:[%s3797_s17 + $0x8] sm:$0xff] %v1178_v56  ;;  %v1809_v21 = vmul.f32 %v3755_v24, %v1676_v33  ;;  %v990_v48 = vand.u32 2147483647, %v3905_v58  ;;  %vm988_vm12 = vmor %vm986_vm10, %vm987_vm8 }
 0x40f   : > { %v1680_v42 = vmul.f32 %v3935_v16, %v1679_v52  ;;  %v907_v40 = vmul.f32 1.442695, %v882_v50  ;;  %937 = vadd.xlane.f32.xlu1 %v3969_v22  ;;  %867 = vmax.xlane.f32.xlu0 %v3922_v4  ;;  %v1689_v24 = vor.u32 1.1754944e-38, %v1688_v45  ;;  %v3995_v49 = vadd.f32 %v2766_v7, %v835_v28  ;;  %v838_v17 = vpop.f32.mrf.mxu3 }
 0x410   : > { %v984_v54 = vmul.f32 %v2703_v31, %v983_v10  ;;  %1228 = vmatmul.f32.gmra.mxu0 %v1178_v56  ;;  %2423 = vst [vmem:[%s3797_s17 + $0xb0] sm:$0xff] %v1809_v21  ;;  %1934 = vmatmul.f32.gmra.mxu2 %v1809_v21  ;;  %vm991_vm14 = vcmp.eq.f32.partialorder %v990_v48, 8.507059e+37  ;;  %v1702_v12 = vand.u32 2147483648, %v3951_v5  ;;  %vm1696_vm1 = vweird.f32 %v3951_v5 }
 0x411   : > { %2708 = vpow2.f32 %v907_v40  ;;  %v1681_v0 = vadd.f32 %v3935_v16, %v1680_v42  ;;  %v2707_v36 = vpop.eup %2706 }
 0x412   : > { %2710 = vpow2.f32 %v1543_v63  ;;  %v985_v1 = vadd.f32 %v2703_v31, %v984_v54  ;;  %v1692_v20 = vmul.f32 %v2707_v36, %v3951_v5  ;;  %v1498_v34 = vpop.xlane.xlu1 %1497  ;;  %vm1697_vm15 = vweird.f32 %v2707_v36 }
 0x413   : > { %v1685_v55 = vsel %vm1684_vm11, %v3935_v16, %v1681_v0  ;;  %v1514_v53 = vsub.f32 %v3784_v51, %v1498_v34  ;;  %vm1698_vm2 = vmor %vm1696_vm1, %vm1697_vm15 }
 0x414   : > { %v989_v46 = vsel %vm988_vm12, %v2703_v31, %v985_v1  ;;  %v1690_v58 = vsel %vm1687_vm13, %v1689_v24, %v1685_v55  ;;  %v1693_v8 = vsub.f32 1.0, %v1692_v20  ;;  %v1700_v31 = vand.u32 2147483647, %v3951_v5 }
 0x415   : > { %v994_v47 = vsel %vm991_vm14, %v993_v29, %v989_v46  ;;  %v1810_v9 = vmul.f32 %v3764_v30, %v1690_v58  ;;  %v1545_v25 = vmul.f32 1.442695, %v1514_v53  ;;  %v4013_v5 = vadd.f32 %v2766_v7, %v838_v17 }
 0x416   : > { %v1179_v16 = vmul.f32 %v3766_v11, %v994_v47  ;;  %v1694_v51 = vmul.f32 %v2707_v36, %v1693_v8  ;;  %v1703_v11 = vor.u32 1.1754944e-38, %v1702_v12  ;;  %vm1701_vm3 = vcmp.eq.f32.partialorder %v1700_v31, 8.507059e+37 }
 0x417   : > { %v3999_v13 = vpop.eup %2708  ;;  %2424 = vst [vmem:[%s3797_s17 + $0xb8] sm:$0xff] %v1810_v9  ;;  %2712 = vpow2.f32 %v1545_v25  ;;  %869 = vmax.xlane.f32.xlu0 %v3995_v49 }
 0x418   : > { %v4003_v61 = vpop.eup %2710  ;;  %1195 = vst [vmem:[%s3797_s17 + $0x10] sm:$0xff] %v1179_v16  ;;  %1231 = vmatmul.f32.gmra.mxu0 %v1179_v16  ;;  %939 = vadd.xlane.f32.xlu1 %v3999_v13  ;;  %v1695_v30 = vadd.f32 %v2707_v36, %v1694_v51 }
 0x419   : > { %1575 = vadd.xlane.f32.xlu2 %v4003_v61  ;;  %1937 = vmatmul.f32.gmra.mxu2 %v1810_v9 }
 0x41a   : > { %v930_v3 = vpop.xlane.xlu1 %929  ;;  %v1699_v27 = vsel %vm1698_vm2, %v2707_v36, %v1695_v30 }
 0x41b   : > { %2714 = vrcp.f32 %v930_v3  ;;  %v1704_v35 = vsel %vm1701_vm3, %v1703_v11, %v1699_v27  ;;  %v1020_v60 = vand.u32 2147483648, %v930_v3  ;;  %v1018_v56 = vand.u32 2147483647, %v930_v3 }
 0x41c   : > { %v1811_v38 = vmul.f32 %v3774_v41, %v1704_v35  ;;  %vm1014_vm5 = vweird.f32 %v930_v3 }
 0x41d   : > { %v4011_v44 = vpop.eup %2712  ;;  %v1021_v63 = vor.u32 1.1754944e-38, %v1020_v60  ;;  %vm1019_vm7 = vcmp.eq.f32.partialorder %v1018_v56, 8.507059e+37 }
 0x41e   : > { %2425 = vst [vmem:[%s3797_s17 + $0xc0] sm:$0xff] %v1811_v38 }
 0x41f   : > { %871 = vmax.xlane.f32.xlu0 %v4013_v5 }
 0x420   : > { %v1566_v45 = vpop.xlane.xlu2 %1565 }
 0x421   : > { %1577 = vadd.xlane.f32.xlu2 %v4011_v44  ;;  %v2715_v52 = vpop.eup %2714  ;;  %1940 = vmatmul.f32.gmra.mxu2 %v1811_v38  ;;  %2716 = vrcp.f32 %v1566_v45  ;;  %v1716_v21 = vand.u32 2147483648, %v1566_v45  ;;  %v1714_v36 = vand.u32 2147483647, %v1566_v45  ;;  %vm1710_vm9 = vweird.f32 %v1566_v45 }
 0x422   : > { %v1010_v50 = vmul.f32 %v2715_v52, %v930_v3  ;;  %vm1015_vm4 = vweird.f32 %v2715_v52 }
 0x423   : > { %vm1016_vm6 = vmor %vm1014_vm5, %vm1015_vm4  ;;  %v1717_v20 = vor.u32 1.1754944e-38, %v1716_v21  ;;  %vm1715_vm11 = vcmp.eq.f32.partialorder %v1714_v36, 8.507059e+37 }
 0x424   : > { %v1011_v6 = vsub.f32 1.0, %v1010_v50 }
 0x426   : > { %v1012_v10 = vmul.f32 %v2715_v52, %v1011_v6 }
 0x427   : > { %v2717_v41 = vpop.eup %2716 }
 0x428   : > { %v1706_v32 = vmul.f32 %v2717_v41, %v1566_v45  ;;  %v1568_v42 = vpop.xlane.xlu2 %1567  ;;  %v1013_v40 = vadd.f32 %v2715_v52, %v1012_v10  ;;  %vm1711_vm8 = vweird.f32 %v2717_v41 }
 0x429   : > { %2718 = vrcp.f32 %v1568_v42  ;;  %vm1712_vm10 = vmor %vm1710_vm9, %vm1711_vm8  ;;  %v1730_v8 = vand.u32 2147483648, %v1568_v42  ;;  %v1728_v7 = vand.u32 2147483647, %v1568_v42  ;;  %vm1724_vm13 = vweird.f32 %v1568_v42 }
 0x42a   : > { %v1707_v33 = vsub.f32 1.0, %v1706_v32  ;;  %v1017_v54 = vsel %vm1016_vm6, %v2715_v52, %v1013_v40 }
 0x42b   : > { %v1022_v48 = vsel %vm1019_vm7, %v1021_v63, %v1017_v54  ;;  %v1731_v16 = vor.u32 1.1754944e-38, %v1730_v8  ;;  %vm1729_vm15 = vcmp.eq.f32.partialorder %v1728_v7, 8.507059e+37 }
 0x42c   : > { %v1708_v0 = vmul.f32 %v2717_v41, %v1707_v33  ;;  %v4019_v1 = vmul.f32 %v3788_v59, %v1022_v48 }
 0x42e   : > { %v1709_v24 = vadd.f32 %v2717_v41, %v1708_v0  ;;  %1197 = vst [vmem:[%s3797_s17 + $0x20] sm:$0xff] %v4019_v1 }
 0x42f   : > { %v2719_v28 = vpop.eup %2718 }
 0x430   : > { %v1720_v34 = vmul.f32 %v2719_v28, %v1568_v42  ;;  %v932_v29 = vpop.xlane.xlu1 %931  ;;  %v1713_v55 = vsel %vm1712_vm10, %v2717_v41, %v1709_v24  ;;  %vm1725_vm12 = vweird.f32 %v2719_v28 }
 0x431   : > { %2720 = vrcp.f32 %v932_v29  ;;  %v1570_v53 = vpop.xlane.xlu2 %1569  ;;  %v1718_v46 = vsel %vm1715_vm11, %v1717_v20, %v1713_v55  ;;  %vm1726_vm14 = vmor %vm1724_vm13, %vm1725_vm12  ;;  %v1032_v38 = vand.u32 2147483647, %v932_v29  ;;  %v1034_v45 = vand.u32 2147483648, %v932_v29 }
 0x432   : > { %v1721_v58 = vsub.f32 1.0, %v1720_v34  ;;  %2722 = vrcp.f32 %v1570_v53  ;;  %v1812_v47 = vmul.f32 %v3794_v23, %v1718_v46  ;;  %v1744_v50 = vand.u32 2147483648, %v1570_v53 }
 0x433   : > { %v4023_v59 = vpop.f32.mrf.mxu2  ;;  %v1742_v10 = vand.u32 2147483647, %v1570_v53  ;;  %vm1028_vm3 = vweird.f32 %v932_v29  ;;  %vm1738_vm4 = vweird.f32 %v1570_v53  ;;  %v1035_v41 = vor.u32 1.1754944e-38, %v1034_v45 }
 0x434   : > { %v1722_v9 = vmul.f32 %v2719_v28, %v1721_v58  ;;  %2426 = vst [vmem:[%s3797_s17 + $0xc8] sm:$0xff] %v1812_v47  ;;  %1943 = vmatmul.f32.gmra.mxu2 %v1812_v47  ;;  %v1745_v32 = vor.u32 1.1754944e-38, %v1744_v50  ;;  %vm1033_vm7 = vcmp.eq.f32.partialorder %v1032_v38, 8.507059e+37 }
 0x435   : > { %vm1743_vm8 = vcmp.eq.f32.partialorder %v1742_v10, 8.507059e+37 }
 0x436   : > { %v1723_v12 = vadd.f32 %v2719_v28, %v1722_v9 }
 0x437   : > { %v2721_v25 = vpop.eup %2720 }
 0x438   : > { %v2723_v51 = vpop.eup %2722  ;;  %v1024_v31 = vmul.f32 %v2721_v25, %v932_v29  ;;  %v1727_v30 = vsel %vm1726_vm14, %v2719_v28, %v1723_v12  ;;  %vm1029_vm1 = vweird.f32 %v2721_v25 }
 0x439   : > { %v1734_v11 = vmul.f32 %v2723_v51, %v1570_v53  ;;  %v1732_v17 = vsel %vm1729_vm15, %v1731_v16, %v1727_v30  ;;  %vm1739_vm2 = vweird.f32 %v2723_v51  ;;  %vm1030_vm5 = vmor %vm1028_vm3, %vm1029_vm1 }
 0x43a   : > { %v1025_v3 = vsub.f32 1.0, %v1024_v31  ;;  %v1813_v23 = vmul.f32 %v3802_v43, %v1732_v17  ;;  %vm1740_vm6 = vmor %vm1738_vm4, %vm1739_vm2 }
 0x43b   : > { %v1735_v27 = vsub.f32 1.0, %v1734_v11  ;;  %v4028_v35 = vpop.f32.mrf.mxu2 }
 0x43c   : > { %v1026_v52 = vmul.f32 %v2721_v25, %v1025_v3  ;;  %v2631_v6 = vpack.i.bf16 %v4028_v35, %v4023_v59  ;;  %2427 = vst [vmem:[%s3797_s17 + $0xd0] sm:$0xff] %v1813_v23  ;;  %1946 = vmatmul.f32.gmra.mxu2 %v1813_v23 }
 0x43d   : > { %v1736_v60 = vmul.f32 %v2723_v51, %v1735_v27 }
 0x43e   : > { %v1027_v56 = vadd.f32 %v2721_v25, %v1026_v52 }
 0x43f   : > { %v1737_v43 = vadd.f32 %v2723_v51, %v1736_v60 }
 0x440   : > { %v1031_v42 = vsel %vm1030_vm5, %v2721_v25, %v1027_v56 }
 0x441   : > { %v1741_v40 = vsel %vm1740_vm6, %v2723_v51, %v1737_v43  ;;  %v1036_v63 = vsel %vm1033_vm7, %v1035_v41, %v1031_v42 }
 0x442   : > { %v1746_v33 = vsel %vm1743_vm8, %v1745_v32, %v1741_v40  ;;  %v4034_v54 = vmul.f32 %v3808_v18, %v1036_v63 }
 0x443   : > { %v1814_v21 = vmul.f32 %v3810_v62, %v1746_v33  ;;  %v4052_v38 = vpop.f32.mrf.mxu2 }
 0x444   : > { %1198 = vst [vmem:[%s3797_s17 + $0x28] sm:$0xff] %v4034_v54 }
 0x445   : > { %2428 = vst [vmem:[%s3797_s17 + $0xd8] sm:$0xff] %v1814_v21  ;;  %1949 = vmatmul.f32.gmra.mxu2 %v1814_v21 }
 0x461   : > { %v928_v48 = vpop.xlane.xlu0 %927 }
 0x462   : > { %2724 = vrcp.f32 %v928_v48  ;;  %v1006_v55 = vand.u32 2147483648, %v928_v48  ;;  %v1004_v53 = vand.u32 2147483647, %v928_v48  ;;  %vm1000_vm10 = vweird.f32 %v928_v48 }
 0x464   : > { %vm1005_vm12 = vcmp.eq.f32.partialorder %v1004_v53, 8.507059e+37 }
 0x468   : > { %v2725_v0 = vpop.eup %2724 }
 0x469   : > { %v1572_v36 = vpop.xlane.xlu2 %1571  ;;  %v996_v24 = vmul.f32 %v2725_v0, %v928_v48  ;;  %vm1001_vm9 = vweird.f32 %v2725_v0 }
 0x46a   : > { %v4040_v28 = vpop.xlane.xlu1 %933  ;;  %2726 = vrcp.f32 %v1572_v36  ;;  %v862_v20 = vpop.xlane.xlu0 %861  ;;  %vm1002_vm11 = vmor %vm1000_vm10, %vm1001_vm9  ;;  %v1758_v31 = vand.u32 2147483648, %v1572_v36  ;;  %v1756_v27 = vand.u32 2147483647, %v1572_v36  ;;  %vm1752_vm14 = vweird.f32 %v1572_v36 }
 0x46b   : > { %2728 = vrcp.f32 %v4040_v28  ;;  %v883_v18 = vsub.f32 %v3832_v26, %v862_v20  ;;  %v997_v34 = vsub.f32 1.0, %v996_v24  ;;  %v1007_v26 = vor.u32 1.1754944e-38, %v1006_v55 }
 0x46c   : > { %v1048_v50 = vand.u32 2147483648, %v4040_v28  ;;  %v1046_v60 = vand.u32 2147483647, %v4040_v28  ;;  %v1759_v10 = vor.u32 1.1754944e-38, %v1758_v31  ;;  %vm1757_vm2 = vcmp.eq.f32.partialorder %v1756_v27, 8.507059e+37 }
 0x46d   : > { %v909_v29 = vmul.f32 1.442695, %v883_v18  ;;  %v998_v62 = vmul.f32 %v2725_v0, %v997_v34  ;;  %vm1042_vm3 = vweird.f32 %v4040_v28 }
 0x46e   : > { %v1049_v63 = vor.u32 1.1754944e-38, %v1048_v50  ;;  %vm1047_vm5 = vcmp.eq.f32.partialorder %v1046_v60, 8.507059e+37 }
 0x46f   : > { %2730 = vpow2.f32 %v909_v29  ;;  %v999_v58 = vadd.f32 %v2725_v0, %v998_v62 }
 0x470   : > { %v2727_v46 = vpop.eup %2726 }
 0x471   : > { %v2729_v8 = vpop.eup %2728  ;;  %v1748_v47 = vmul.f32 %v2727_v46, %v1572_v36  ;;  %v1003_v25 = vsel %vm1002_vm11, %v2725_v0, %v999_v58  ;;  %vm1753_vm13 = vweird.f32 %v2727_v46 }
 0x472   : > { %v1038_v9 = vmul.f32 %v2729_v8, %v4040_v28  ;;  %v4045_v7 = vpop.xlane.xlu2 %1573  ;;  %v864_v12 = vpop.xlane.xlu0 %863  ;;  %v1008_v11 = vsel %vm1005_vm12, %v1007_v26, %v1003_v25  ;;  %vm1043_vm15 = vweird.f32 %v2729_v8  ;;  %vm1754_vm1 = vmor %vm1752_vm14, %vm1753_vm13 }
 0x473   : > { %v1749_v16 = vsub.f32 1.0, %v1748_v47  ;;  %2732 = vrcp.f32 %v4045_v7  ;;  %v884_v30 = vsub.f32 %v3843_v37, %v864_v12  ;;  %v1180_v23 = vmul.f32 %v3818_v14, %v1008_v11  ;;  %vm1044_vm4 = vmor %vm1042_vm3, %vm1043_vm15 }
 0x474   : > { %v1039_v51 = vsub.f32 1.0, %v1038_v9  ;;  %v1772_v24 = vand.u32 2147483648, %v4045_v7  ;;  %vm1766_vm7 = vweird.f32 %v4045_v7 }
 0x475   : > { %v4049_v17 = vpop.eup %2730  ;;  %v1750_v3 = vmul.f32 %v2727_v46, %v1749_v16  ;;  %v911_v52 = vmul.f32 1.442695, %v884_v30  ;;  %1196 = vst [vmem:[%s3797_s17 + $0x18] sm:$0xff] %v1180_v23  ;;  %1234 = vmatmul.f32.gmra.mxu0 %v1180_v23 }
 0x476   : > { %v1040_v45 = vmul.f32 %v2729_v8, %v1039_v51  ;;  %941 = vadd.xlane.f32.xlu0 %v4049_v17  ;;  %v1773_v62 = vor.u32 1.1754944e-38, %v1772_v24 }
 0x477   : > { %v1751_v37 = vadd.f32 %v2727_v46, %v1750_v3  ;;  %2734 = vpow2.f32 %v911_v52 }
 0x478   : > { %v1041_v14 = vadd.f32 %v2729_v8, %v1040_v45 }
 0x479   : > { %v2733_v56 = vpop.eup %2732  ;;  %v1755_v41 = vsel %vm1754_vm1, %v2727_v46, %v1751_v37  ;;  %v4074_v29 = vpop.f32.mrf.mxu2 }
 0x47a   : > { %v4059_v43 = vpop.xlane.xlu1 %935  ;;  %v1762_v32 = vmul.f32 %v2733_v56, %v4045_v7  ;;  %v866_v42 = vpop.xlane.xlu0 %865  ;;  %v1760_v40 = vsel %vm1757_vm2, %v1759_v10, %v1755_v41  ;;  %v1045_v48 = vsel %vm1044_vm4, %v2729_v8, %v1041_v14  ;;  %vm1767_vm6 = vweird.f32 %v2733_v56 }
 0x47b   : > { %2736 = vrcp.f32 %v4059_v43  ;;  %v885_v33 = vsub.f32 %v3863_v19, %v866_v42  ;;  %v1815_v21 = vmul.f32 %v3829_v39, %v1760_v40  ;;  %v1050_v36 = vsel %vm1047_vm5, %v1049_v63, %v1045_v48  ;;  %vm1768_vm8 = vmor %vm1766_vm7, %vm1767_vm6 }
 0x47c   : > { %v1763_v0 = vsub.f32 1.0, %v1762_v32  ;;  %v4070_v20 = vmul.f32 %v3834_v57, %v1050_v36  ;;  %v1770_v39 = vand.u32 2147483647, %v4045_v7  ;;  %v1062_v12 = vand.u32 2147483648, %v4059_v43 }
 0x47d   : > { %v913_v28 = vmul.f32 1.442695, %v885_v33  ;;  %2429 = vst [vmem:[%s3797_s17 + $0xe0] sm:$0xff] %v1815_v21  ;;  %1952 = vmatmul.f32.gmra.mxu2 %v1815_v21  ;;  %v4072_v18 = vpop.eup %2734  ;;  %1237 = vmatmul.f32.gmra.mxu0 %v4019_v1  ;;  %v1060_v16 = vand.u32 2147483647, %v4059_v43  ;;  %vm1056_vm11 = vweird.f32 %v4059_v43 }
 0x47e   : > { %v1764_v34 = vmul.f32 %v2733_v56, %v1763_v0  ;;  %943 = vadd.xlane.f32.xlu1 %v4072_v18  ;;  %1199 = vst [vmem:[%s3797_s17 + $0x30] sm:$0xff] %v4070_v20  ;;  %vm1771_vm9 = vcmp.eq.f32.partialorder %v1770_v39, 8.507059e+37  ;;  %v1063_v31 = vor.u32 1.1754944e-38, %v1062_v12 }
 0x47f   : > { %2738 = vpow2.f32 %v913_v28  ;;  %vm1061_vm13 = vcmp.eq.f32.partialorder %v1060_v16, 8.507059e+37 }
 0x480   : > { %v1765_v57 = vadd.f32 %v2733_v56, %v1764_v34 }
 0x481   : > { %v2737_v19 = vpop.eup %2736  ;;  %v4093_v51 = vpop.f32.mrf.mxu2 }
 0x482   : > { %v1052_v55 = vmul.f32 %v2737_v19, %v4059_v43  ;;  %v938_v53 = vpop.xlane.xlu1 %937  ;;  %v868_v46 = vpop.xlane.xlu0 %867  ;;  %v1769_v58 = vsel %vm1768_vm8, %v2733_v56, %v1765_v57  ;;  %vm1057_vm10 = vweird.f32 %v2737_v19 }
 0x483   : > { %2740 = vrcp.f32 %v938_v53  ;;  %v886_v1 = vsub.f32 %v3922_v4, %v868_v46  ;;  %v1774_v47 = vsel %vm1771_vm9, %v1773_v62, %v1769_v58  ;;  %vm1058_vm12 = vmor %vm1056_vm11, %vm1057_vm10  ;;  %v1076_v37 = vand.u32 2147483648, %v938_v53 }
 0x484   : > { %v1053_v8 = vsub.f32 1.0, %v1052_v55  ;;  %v1816_v9 = vmul.f32 %v3860_v15, %v1774_v47  ;;  %v1074_v60 = vand.u32 2147483647, %v938_v53  ;;  %vm1070_vm15 = vweird.f32 %v938_v53 }
 0x485   : > { %v4086_v7 = vpop.eup %2738  ;;  %v915_v26 = vmul.f32 1.442695, %v886_v1  ;;  %1240 = vmatmul.f32.gmra.mxu0 %v4034_v54  ;;  %v1077_v43 = vor.u32 1.1754944e-38, %v1076_v37  ;;  %v2060_v37 = vld [vmem:[#allocation10 + $0x78] sm:$0xff] }
 0x486   : > { %v1054_v25 = vmul.f32 %v2737_v19, %v1053_v8  ;;  %945 = vadd.xlane.f32.xlu2 %v4086_v7  ;;  %2430 = vst [vmem:[%s3797_s17 + $0xe8] sm:$0xff] %v1816_v9  ;;  %1955 = vmatmul.f32.gmra.mxu2 %v1816_v9  ;;  %vm1075_vm2 = vcmp.eq.f32.partialorder %v1074_v60, 8.507059e+37  ;;  %v2059_v60 = vld [vmem:[#allocation10 + $0x70] sm:$0xff] }
 0x487   : > { %2742 = vpow2.f32 %v915_v26  ;;  %2446 = vmatpush.msrb.mxu3 %v2060_v37  ;;  %2445 = vmatpush.msra.mxu2 %v2060_v37 }
 0x488   : > { %v1055_v4 = vadd.f32 %v2737_v19, %v1054_v25  ;;  %2065 = vmatpush.msra.mxu0 %v2060_v37  ;;  %2444 = vmatpush.msra.mxu1 %v2060_v37 }
 0x489   : > { %v2741_v15 = vpop.eup %2740  ;;  %v4105_v32 = vpop.f32.mrf.mxu2  ;;  %2449 = vmatpush.msrb.mxu3 %v2059_v60  ;;  %2448 = vmatpush.msra.mxu2 %v2059_v60 }
 0x48a   : > { %v1066_v30 = vmul.f32 %v2741_v15, %v938_v53  ;;  %v1059_v11 = vsel %vm1058_vm12, %v2737_v19, %v1055_v4  ;;  %v870_v3 = vpop.xlane.xlu0 %869  ;;  %vm1071_vm14 = vweird.f32 %v2741_v15  ;;  %2066 = vmatpush.msra.mxu0 %v2059_v60  ;;  %2447 = vmatpush.msra.mxu1 %v2059_v60 }
 0x48b   : > { %v1064_v23 = vsel %vm1061_vm13, %v1063_v31, %v1059_v11  ;;  %v940_v45 = vpop.xlane.xlu1 %939  ;;  %v887_v54 = vsub.f32 %v3995_v49, %v870_v3  ;;  %vm1072_vm1 = vmor %vm1070_vm15, %vm1071_vm14 }
 0x48c   : > { %v1067_v27 = vsub.f32 1.0, %v1066_v30  ;;  %v4095_v52 = vpop.xlane.xlu2 %1575  ;;  %v1184_v50 = vmul.f32 %v3913_v2, %v1064_v23  ;;  %2744 = vrcp.f32 %v940_v45  ;;  %v1090_v34 = vand.u32 2147483648, %v940_v45 }
 0x48d   : > { %v4099_v10 = vpop.eup %2742  ;;  %2746 = vrcp.f32 %v4095_v52  ;;  %v917_v56 = vmul.f32 1.442695, %v887_v54  ;;  %1243 = vmatmul.f32.gmra.mxu0 %v4070_v20  ;;  %v1786_v19 = vand.u32 2147483648, %v4095_v52  ;;  %v1784_v62 = vand.u32 2147483647, %v4095_v52 }
 0x48e   : > { %v1068_v14 = vmul.f32 %v2741_v15, %v1067_v27  ;;  %1200 = vst [vmem:[%s3797_s17 + $0x38] sm:$0xff] %v1184_v50  ;;  %947 = vadd.xlane.f32.xlu0 %v4099_v10  ;;  %vm1084_vm5 = vweird.f32 %v940_v45  ;;  %v1091_v46 = vor.u32 1.1754944e-38, %v1090_v34  ;;  %vm1780_vm6 = vweird.f32 %v4095_v52  ;;  %v2048_v34 = vld [vmem:[#allocation10 + $0x18] sm:$0xff] }
 0x48f   : > { %2748 = vpow2.f32 %v917_v56  ;;  %v1787_v8 = vor.u32 1.1754944e-38, %v1786_v19  ;;  %vm1785_vm10 = vcmp.eq.f32.partialorder %v1784_v62, 8.507059e+37  ;;  %v2056_v56 = vld [vmem:[#allocation10 + $0x58] sm:$0xff] }
 0x490   : > { %v1069_v49 = vadd.f32 %v2741_v15, %v1068_v14  ;;  %v2057_v14 = vld [vmem:[#allocation10 + $0x60] sm:$0xff] }
 0x492   : > { %v1073_v2 = vsel %vm1072_vm1, %v2741_v15, %v1069_v49  ;;  %v2745_v41 = vpop.eup %2744  ;;  %v872_v42 = vpop.xlane.xlu0 %871  ;;  %v2055_v49 = vld [vmem:[#allocation10 + $0x50] sm:$0xff] }
 0x493   : > { %v1078_v40 = vsel %vm1075_vm2, %v1077_v43, %v1073_v2  ;;  %v2747_v63 = vpop.eup %2746  ;;  %v1080_v33 = vmul.f32 %v2745_v41, %v940_v45  ;;  %v888_v48 = vsub.f32 %v4013_v5, %v872_v42  ;;  %vm1085_vm3 = vweird.f32 %v2745_v41  ;;  %v1935_v9 = vpop.f32.mrf.mxu2  ;;  %v2054_v2 = vld [vmem:[#allocation10 + $0x48] sm:$0xff] }
 0x494   : > { %v1578_v21 = vpop.xlane.xlu2 %1577  ;;  %v1185_v0 = vmul.f32 %v3969_v22, %v1078_v40  ;;  %v1776_v36 = vmul.f32 %v2747_v63, %v4095_v52  ;;  %v1088_v5 = vand.u32 2147483647, %v940_v45  ;;  %vm1781_vm4 = vweird.f32 %v2747_v63  ;;  %vm1086_vm7 = vmor %vm1084_vm5, %vm1085_vm3  ;;  %v4141_v42 = vpop.f32.mrf.mxu0  ;;  %v2051_v40 = vld [vmem:[#allocation10 + $0x30] sm:$0xff] }
 0x495   : > { %2750 = vrcp.f32 %v1578_v21  ;;  %v4110_v24 = vpop.eup %2748  ;;  %v1081_v28 = vsub.f32 1.0, %v1080_v33  ;;  %v919_v20 = vmul.f32 1.442695, %v888_v48  ;;  %1246 = vmatmul.f32.gmra.mxu0 %v1184_v50  ;;  %vm1782_vm8 = vmor %vm1780_vm6, %vm1781_vm4  ;;  %v1800_v31 = vand.u32 2147483648, %v1578_v21 }
 0x496   : > { %1201 = vst [vmem:[%s3797_s17 + $0x40] sm:$0xff] %v1185_v0  ;;  %v1777_v39 = vsub.f32 1.0, %v1776_v36  ;;  %949 = vadd.xlane.f32.xlu1 %v4110_v24  ;;  %vm1089_vm9 = vcmp.eq.f32.partialorder %v1088_v5, 8.507059e+37  ;;  %v1798_v3 = vand.u32 2147483647, %v1578_v21  ;;  %vm1794_vm12 = vweird.f32 %v1578_v21 }
 0x497   : > { %v1082_v57 = vmul.f32 %v2745_v41, %v1081_v28  ;;  %2752 = vpow2.f32 %v919_v20  ;;  %v1801_v27 = vor.u32 1.1754944e-38, %v1800_v31  ;;  %v2049_v20 = vld [vmem:[#allocation10 + $0x20] sm:$0xff] }
 0x498   : > { %v1778_v22 = vmul.f32 %v2747_v63, %v1777_v39  ;;  %vm1799_vm14 = vcmp.eq.f32.partialorder %v1798_v3, 8.507059e+37 }
 0x499   : > { %v1083_v55 = vadd.f32 %v2745_v41, %v1082_v57  ;;  %v2047_v57 = vld [vmem:[#allocation10 + $0x10] sm:$0xff] }
 0x49a   : > { %v1779_v58 = vadd.f32 %v2747_v63, %v1778_v22 }
 0x49b   : > { %v2751_v53 = vpop.eup %2750  ;;  %v1087_v47 = vsel %vm1086_vm7, %v2745_v41, %v1083_v55  ;;  %v2053_v41 = vld [vmem:[#allocation10 + $0x40] sm:$0xff] }
 0x49c   : > { %v1790_v1 = vmul.f32 %v2751_v53, %v1578_v21  ;;  %v1783_v12 = vsel %vm1782_vm8, %v2747_v63, %v1779_v58  ;;  %v1092_v25 = vsel %vm1089_vm9, %v1091_v46, %v1087_v47  ;;  %vm1795_vm11 = vweird.f32 %v2751_v53  ;;  %v1938_v52 = vpop.f32.mrf.mxu2  ;;  %v4154_v62 = vpop.f32.mrf.mxu0 }
 0x49d   : > { %v4117_v26 = vpop.eup %2752  ;;  %v1788_v4 = vsel %vm1785_vm10, %v1787_v8, %v1783_v12  ;;  %v1186_v15 = vmul.f32 %v3999_v13, %v1092_v25  ;;  %1249 = vmatmul.f32.gmra.mxu0 %v1185_v0  ;;  %vm1796_vm13 = vmor %vm1794_vm12, %vm1795_vm11  ;;  %v2050_v0 = vld [vmem:[#allocation10 + $0x28] sm:$0xff]  ;;  %v2045_v25 = vld [vmem:[#allocation10] sm:$0xff] }
 0x49e   : > { %v1791_v16 = vsub.f32 1.0, %v1790_v1  ;;  %951 = vadd.xlane.f32.xlu2 %v4117_v26  ;;  %v1817_v30 = vmul.f32 %v4003_v61, %v1788_v4  ;;  %v2046_v1 = vld [vmem:[#allocation10 + $0x8] sm:$0xff] }
 0x49f   : > { %1202 = vst [vmem:[%s3797_s17 + $0x48] sm:$0xff] %v1186_v15 }
 0x4a0   : > { %v1792_v11 = vmul.f32 %v2751_v53, %v1791_v16  ;;  %2431 = vst [vmem:[%s3797_s17 + $0xf0] sm:$0xff] %v1817_v30  ;;  %1958 = vmatmul.f32.gmra.mxu2 %v1817_v30 }
 0x4a2   : > { %v1793_v23 = vadd.f32 %v2751_v53, %v1792_v11  ;;  %1987 = vrot.lane.b32.xlu0 %v4074_v29, %s3036_s30 }
 0x4a4   : > { %v1797_v13 = vsel %vm1796_vm13, %v2751_v53, %v1793_v23  ;;  %v1941_v54 = vpop.f32.mrf.mxu2 }
 0x4a5   : > { %v1802_v45 = vsel %vm1799_vm14, %v1801_v27, %v1797_v13  ;;  %1252 = vmatmul.f32.gmra.mxu0 %v1186_v15  ;;  %v4165_v27 = vpop.f32.mrf.mxu0 }
 0x4a6   : > { %v1818_v61 = vmul.f32 %v4011_v44, %v1802_v45 }
 0x4a8   : > { %2432 = vst [vmem:[%s3797_s17 + $0xf8] sm:$0xff] %v1818_v61  ;;  %1961 = vmatmul.f32.gmra.mxu2 %v1818_v61 }
 0x4aa   : > { %1993 = vrot.lane.b32.xlu0 %v1935_v9, %s3036_s30 }
 0x4af   : > { %1989 = vrot.lane.b32.xlu1 %v4093_v51, %s3036_s30  ;;  %v2058_v51 = vld [vmem:[#allocation10 + $0x68] sm:$0xff] }
 0x4b0   : > { %2452 = vmatpush.msrb.mxu3 %v2058_v51  ;;  %2067 = vmatpush.msra.mxu0 %v2058_v51 }
 0x4b1   : > { %2450 = vmatpush.msra.mxu1 %v2058_v51  ;;  %2451 = vmatpush.msra.mxu2 %v2058_v51 }
 0x4b2   : > { %1997 = vrot.lane.b32.xlu0 %v1941_v54, %s3036_s30  ;;  %2455 = vmatpush.msrb.mxu3 %v2057_v14 }
 0x4b3   : > { %2068 = vmatpush.msra.mxu0 %v2057_v14  ;;  %2453 = vmatpush.msra.mxu1 %v2057_v14 }
 0x4b4   : > { %2454 = vmatpush.msra.mxu2 %v2057_v14  ;;  %2458 = vmatpush.msrb.mxu3 %v2056_v56 }
 0x4b5   : > { %2069 = vmatpush.msra.mxu0 %v2056_v56  ;;  %2456 = vmatpush.msra.mxu1 %v2056_v56 }
 0x4b6   : > { %1991 = vrot.lane.b32.xlu2 %v4105_v32, %s3036_s30  ;;  %2457 = vmatpush.msra.mxu2 %v2056_v56  ;;  %v2052_v32 = vld [vmem:[#allocation10 + $0x38] sm:$0xff] }
 0x4b7   : > { %1995 = vrot.lane.b32.xlu1 %v1938_v52, %s3036_s30  ;;  %v1944_v29 = vpop.f32.mrf.mxu2  ;;  %2461 = vmatpush.msrb.mxu3 %v2055_v49 }
 0x4b8   : > { %2070 = vmatpush.msra.mxu0 %v2055_v49  ;;  %2459 = vmatpush.msra.mxu1 %v2055_v49 }
 0x4b9   : > { %2460 = vmatpush.msra.mxu2 %v2055_v49  ;;  %2464 = vmatpush.msrb.mxu3 %v2054_v2 }
 0x4ba   : > { %2071 = vmatpush.msra.mxu0 %v2054_v2  ;;  %2462 = vmatpush.msra.mxu1 %v2054_v2 }
 0x4bb   : > { %2463 = vmatpush.msra.mxu2 %v2054_v2  ;;  %2467 = vmatpush.msrb.mxu3 %v2053_v41 }
 0x4bc   : > { %2072 = vmatpush.msra.mxu0 %v2053_v41  ;;  %2465 = vmatpush.msra.mxu1 %v2053_v41 }
 0x4bd   : > { %2466 = vmatpush.msra.mxu2 %v2053_v41  ;;  %2470 = vmatpush.msrb.mxu3 %v2052_v32 }
 0x4be   : > { %1999 = vrot.lane.b32.xlu2 %v1944_v29, %s3036_s30  ;;  %2073 = vmatpush.msra.mxu0 %v2052_v32 }
 0x4bf   : > { %v1947_v44 = vpop.f32.mrf.mxu2  ;;  %2468 = vmatpush.msra.mxu1 %v2052_v32  ;;  %2469 = vmatpush.msra.mxu2 %v2052_v32 }
 0x4c0   : > { %2001 = vrot.lane.b32.xlu1 %v1947_v44, %s3036_s30  ;;  %2473 = vmatpush.msrb.mxu3 %v2051_v40 }
 0x4c1   : > { %2074 = vmatpush.msra.mxu0 %v2051_v40  ;;  %2471 = vmatpush.msra.mxu1 %v2051_v40 }
 0x4c2   : > { %2472 = vmatpush.msra.mxu2 %v2051_v40  ;;  %2476 = vmatpush.msrb.mxu3 %v2050_v0 }
 0x4c3   : > { %2075 = vmatpush.msra.mxu0 %v2050_v0  ;;  %2474 = vmatpush.msra.mxu1 %v2050_v0 }
 0x4c4   : > { %2475 = vmatpush.msra.mxu2 %v2050_v0  ;;  %2479 = vmatpush.msrb.mxu3 %v2049_v20 }
 0x4c5   : > { %2076 = vmatpush.msra.mxu0 %v2049_v20  ;;  %2477 = vmatpush.msra.mxu1 %v2049_v20 }
 0x4c6   : > { %2478 = vmatpush.msra.mxu2 %v2049_v20  ;;  %2482 = vmatpush.msrb.mxu3 %v2048_v34 }
 0x4c7   : > { %2077 = vmatpush.msra.mxu0 %v2048_v34  ;;  %2480 = vmatpush.msra.mxu1 %v2048_v34 }
 0x4c8   : > { %v1950_v50 = vpop.f32.mrf.mxu2  ;;  %2481 = vmatpush.msra.mxu2 %v2048_v34  ;;  %2485 = vmatpush.msrb.mxu3 %v2047_v57 }
 0x4c9   : > { %2003 = vrot.lane.b32.xlu0 %v1950_v50, %s3036_s30  ;;  %2078 = vmatpush.msra.mxu0 %v2047_v57 }
 0x4ca   : > { %2483 = vmatpush.msra.mxu1 %v2047_v57  ;;  %2484 = vmatpush.msra.mxu2 %v2047_v57 }
 0x4cb   : > { %2488 = vmatpush.msrb.mxu3 %v2046_v1  ;;  %2079 = vmatpush.msra.mxu0 %v2046_v1 }
 0x4cc   : > { %2486 = vmatpush.msra.mxu1 %v2046_v1  ;;  %2487 = vmatpush.msra.mxu2 %v2046_v1 }
 0x4cd   : > { %2491 = vmatpush.msrb.mxu3 %v2045_v25  ;;  %2080 = vmatpush.msra.mxu0 %v2045_v25 }
 0x4ce   : > { %2489 = vmatpush.msra.mxu1 %v2045_v25  ;;  %2490 = vmatpush.msra.mxu2 %v2045_v25 }
 0x4e9   : > { %v4138_v43 = vpop.xlane.xlu0 %941 }
 0x4ea   : > { %2754 = vrcp.f32 %v4138_v43  ;;  %v1104_v28 = vand.u32 2147483648, %v4138_v43  ;;  %v1102_v39 = vand.u32 2147483647, %v4138_v43  ;;  %vm1098_vm1 = vweird.f32 %v4138_v43 }
 0x4ec   : > { %v1105_v55 = vor.u32 1.1754944e-38, %v1104_v28  ;;  %vm1103_vm3 = vcmp.eq.f32.partialorder %v1102_v39, 8.507059e+37 }
 0x4f0   : > { %v2755_v63 = vpop.eup %2754 }
 0x4f1   : > { %v1094_v33 = vmul.f32 %v2755_v63, %v4138_v43  ;;  %v4144_v21 = vpop.xlane.xlu1 %943  ;;  %vm1099_vm15 = vweird.f32 %v2755_v63 }
 0x4f2   : > { %2756 = vrcp.f32 %v4144_v21  ;;  %vm4150_vm2 = vmor %vm1098_vm1, %vm1099_vm15  ;;  %v1118_v12 = vand.u32 2147483648, %v4144_v21  ;;  %v1116_v4 = vand.u32 2147483647, %v4144_v21  ;;  %vm1112_vm5 = vweird.f32 %v4144_v21  ;;  %v1235_v49 = vpop.f32.mrf.mxu0 }
 0x4f3   : > { %v1095_v48 = vsub.f32 1.0, %v1094_v33 }
 0x4f4   : > { %v1119_v30 = vor.u32 1.1754944e-38, %v1118_v12  ;;  %vm1117_vm7 = vcmp.eq.f32.partialorder %v1116_v4, 8.507059e+37 }
 0x4f5   : > { %v1096_v36 = vmul.f32 %v2755_v63, %v1095_v48 }
 0x4f7   : > { %v1097_v19 = vadd.f32 %v2755_v63, %v1096_v36 }
 0x4f8   : > { %v2757_v22 = vpop.eup %2756 }
 0x4f9   : > { %v946_v53 = vpop.xlane.xlu2 %945  ;;  %v1101_v46 = vsel %vm4150_vm2, %v2755_v63, %v1097_v19  ;;  %v1108_v58 = vmul.f32 %v2757_v22, %v4144_v21  ;;  %vm1113_vm4 = vweird.f32 %v2757_v22 }
 0x4fa   : > { %2758 = vrcp.f32 %v946_v53  ;;  %v1106_v8 = vsel %vm1103_vm3, %v1105_v55, %v1101_v46  ;;  %vm1114_vm6 = vmor %vm1112_vm5, %vm1113_vm4  ;;  %v1132_v61 = vand.u32 2147483648, %v946_v53  ;;  %v1130_v29 = vand.u32 2147483647, %v946_v53  ;;  %v1238_v19 = vpop.f32.mrf.mxu0 }
 0x4fb   : > { %v1109_v47 = vsub.f32 1.0, %v1108_v58  ;;  %v1187_v9 = vmul.f32 %v4049_v17, %v1106_v8  ;;  %vm1126_vm9 = vweird.f32 %v946_v53 }
 0x4fc   : > { %v1133_v37 = vor.u32 1.1754944e-38, %v1132_v61  ;;  %vm1131_vm11 = vcmp.eq.f32.partialorder %v1130_v29, 8.507059e+37 }
 0x4fd   : > { %v1110_v16 = vmul.f32 %v2757_v22, %v1109_v47  ;;  %1203 = vst [vmem:[%s3797_s17 + $0x50] sm:$0xff] %v1187_v9  ;;  %1255 = vmatmul.f32.gmra.mxu0 %v1187_v9 }
 0x4ff   : > { %v1111_v31 = vadd.f32 %v2757_v22, %v1110_v16 }
 0x500   : > { %v2759_v15 = vpop.eup %2758  ;;  %v1953_v17 = vpop.f32.mrf.mxu2 }
 0x501   : > { %v1122_v11 = vmul.f32 %v2759_v15, %v946_v53  ;;  %v948_v3 = vpop.xlane.xlu0 %947  ;;  %2005 = vrot.lane.b32.xlu2 %v1953_v17, %s3036_s30  ;;  %v1115_v23 = vsel %vm1114_vm6, %v2757_v22, %v1111_v31  ;;  %vm1127_vm8 = vweird.f32 %v2759_v15 }
 0x502   : > { %2760 = vrcp.f32 %v948_v3  ;;  %v1120_v45 = vsel %vm1117_vm7, %v1119_v30, %v1115_v23  ;;  %vm1128_vm10 = vmor %vm1126_vm9, %vm1127_vm8  ;;  %v1146_v41 = vand.u32 2147483648, %v948_v3  ;;  %v1144_v40 = vand.u32 2147483647, %v948_v3  ;;  %v1241_v9 = vpop.f32.mrf.mxu0 }
 0x503   : > { %v1123_v13 = vsub.f32 1.0, %v1122_v11  ;;  %v1188_v52 = vmul.f32 %v4072_v18, %v1120_v45  ;;  %vm1140_vm13 = vweird.f32 %v948_v3 }
 0x504   : > { %v1147_v21 = vor.u32 1.1754944e-38, %v1146_v41  ;;  %vm1145_vm15 = vcmp.eq.f32.partialorder %v1144_v40, 8.507059e+37 }
 0x505   : > { %v1124_v54 = vmul.f32 %v2759_v15, %v1123_v13  ;;  %1204 = vst [vmem:[%s3797_s17 + $0x58] sm:$0xff] %v1188_v52  ;;  %1258 = vmatmul.f32.gmra.mxu0 %v1188_v52 }
 0x507   : > { %v1125_v44 = vadd.f32 %v2759_v15, %v1124_v54 }
 0x508   : > { %v2761_v50 = vpop.eup %2760 }
 0x509   : > { %v1136_v60 = vmul.f32 %v2761_v50, %v948_v3  ;;  %v950_v51 = vpop.xlane.xlu1 %949  ;;  %v1956_v14 = vpop.f32.mrf.mxu2  ;;  %v1129_v56 = vsel %vm1128_vm10, %v2759_v15, %v1125_v44  ;;  %vm1141_vm12 = vweird.f32 %v2761_v50 }
 0x50a   : > { %2762 = vrcp.f32 %v950_v51  ;;  %2007 = vrot.lane.b32.xlu1 %v1956_v14, %s3036_s30  ;;  %v1134_v18 = vsel %vm1131_vm11, %v1133_v37, %v1129_v56  ;;  %vm1142_vm14 = vmor %vm1140_vm13, %vm1141_vm12  ;;  %v1160_v34 = vand.u32 2147483648, %v950_v51  ;;  %v1158_v22 = vand.u32 2147483647, %v950_v51  ;;  %v1244_v11 = vpop.f32.mrf.mxu0 }
 0x50b   : > { %v1137_v43 = vsub.f32 1.0, %v1136_v60  ;;  %v1189_v2 = vmul.f32 %v4086_v7, %v1134_v18  ;;  %vm1154_vm2 = vweird.f32 %v950_v51 }
 0x50c   : > { %v1161_v35 = vor.u32 1.1754944e-38, %v1160_v34  ;;  %vm1159_vm4 = vcmp.eq.f32.partialorder %v1158_v22, 8.507059e+37 }
 0x50d   : > { %v1138_v32 = vmul.f32 %v2761_v50, %v1137_v43  ;;  %1205 = vst [vmem:[%s3797_s17 + $0x60] sm:$0xff] %v1189_v2  ;;  %1261 = vmatmul.f32.gmra.mxu0 %v1189_v2 }
 0x50f   : > { %v1139_v63 = vadd.f32 %v2761_v50, %v1138_v32 }
 0x510   : > { %v2763_v33 = vpop.eup %2762 }
 0x511   : > { %v1150_v48 = vmul.f32 %v2763_v33, %v950_v51  ;;  %v952_v0 = vpop.xlane.xlu2 %951  ;;  %v1143_v36 = vsel %vm1142_vm14, %v2761_v50, %v1139_v63  ;;  %vm1155_vm1 = vweird.f32 %v2763_v33 }
 0x512   : > { %2764 = vrcp.f32 %v952_v0  ;;  %2632 = vrot.lane.b32.xlu1 %v2631_v6, %s3036_s30  ;;  %v1148_v7 = vsel %vm1145_vm15, %v1147_v21, %v1143_v36  ;;  %vm1156_vm3 = vmor %vm1154_vm2, %vm1155_vm1  ;;  %v1174_v8 = vand.u32 2147483648, %v952_v0  ;;  %v1172_v47 = vand.u32 2147483647, %v952_v0  ;;  %v1247_v52 = vpop.f32.mrf.mxu0 }
 0x513   : > { %v1151_v28 = vsub.f32 1.0, %v1150_v48  ;;  %v1190_v20 = vmul.f32 %v4099_v10, %v1148_v7  ;;  %vm1168_vm6 = vweird.f32 %v952_v0 }
 0x514   : > { %v1988_v39 = vpop.permute.xlu0 %1987  ;;  %v1175_v25 = vor.u32 1.1754944e-38, %v1174_v8  ;;  %vm1173_vm8 = vcmp.eq.f32.partialorder %v1172_v47, 8.507059e+37 }
 0x515   : > { %v1152_v57 = vmul.f32 %v2763_v33, %v1151_v28  ;;  %1206 = vst [vmem:[%s3797_s17 + $0x68] sm:$0xff] %v1190_v20  ;;  %v2032_v5 = vsel %vm679_vm0, %v1235_v49, %v1988_v39  ;;  %1264 = vmatmul.f32.gmra.mxu0 %v1190_v20 }
 0x516   : > { %2090 = vmatmul.f32.vlgmr.msrb.gmra.mxu3 %v2032_v5 }
 0x517   : > { %v1153_v55 = vadd.f32 %v2763_v33, %v1152_v57 }
 0x518   : > { %v2765_v59 = vpop.eup %2764 }
 0x519   : > { %v1164_v6 = vmul.f32 %v2765_v59, %v952_v0  ;;  %v1157_v53 = vsel %vm1156_vm3, %v2763_v33, %v1153_v55  ;;  %vm1169_vm5 = vweird.f32 %v2765_v59  ;;  %v1992_v30 = vpop.permute.xlu2 %1991 }
 0x51a   : > { %v1162_v10 = vsel %vm1159_vm4, %v1161_v35, %v1157_v53  ;;  %vm1170_vm7 = vmor %vm1168_vm6, %vm1169_vm5  ;;  %v2034_v3 = vsel %vm679_vm0, %v1241_v9, %v1992_v30  ;;  %v1250_v29 = vpop.f32.mrf.mxu0 }
 0x51b   : > { %v1165_v46 = vsub.f32 1.0, %v1164_v6  ;;  %v1191_v58 = vmul.f32 %v4110_v24, %v1162_v10 }
 0x51c   : > { %v1994_v45 = vpop.permute.xlu0 %1993 }
 0x51d   : > { %v1166_v1 = vmul.f32 %v2765_v59, %v1165_v46  ;;  %1207 = vst [vmem:[%s3797_s17 + $0x70] sm:$0xff] %v1191_v58  ;;  %1267 = vmatmul.f32.gmra.mxu0 %v1191_v58  ;;  %v2035_v61 = vsel %vm679_vm0, %v1244_v11, %v1994_v45 }
 0x51f   : > { %v1167_v12 = vadd.f32 %v2765_v59, %v1166_v1 }
 0x521   : > { %v1990_v16 = vpop.permute.xlu1 %1989  ;;  %v1171_v4 = vsel %vm1170_vm7, %v2765_v59, %v1167_v12  ;;  %v2000_v60 = vpop.permute.xlu2 %1999 }
 0x522   : > { %v2033_v15 = vsel %vm679_vm0, %v1238_v19, %v1990_v16  ;;  %v1176_v17 = vsel %vm1173_vm8, %v1175_v25, %v1171_v4  ;;  %v1253_v37 = vpop.f32.mrf.mxu0 }
 0x523   : > { %v1959_v31 = vpop.f32.mrf.mxu2  ;;  %2093 = vmatmul.f32.gmra.mxu3 %v2033_v15  ;;  %v1192_v24 = vmul.f32 %v4117_v26, %v1176_v17 }
 0x524   : > { %2009 = vrot.lane.b32.xlu0 %v1959_v31, %s3036_s30  ;;  %v1998_v44 = vpop.permute.xlu0 %1997 }
 0x525   : > { %1208 = vst [vmem:[%s3797_s17 + $0x78] sm:$0xff] %v1192_v24  ;;  %1270 = vmatmul.f32.gmra.mxu0 %v1192_v24  ;;  %v2037_v50 = vsel %vm679_vm0, %v1250_v29, %v1998_v44 }
 0x529   : > { %v1996_v26 = vpop.permute.xlu1 %1995 }
 0x52a   : > { %v2036_v54 = vsel %vm679_vm0, %v1247_v52, %v1996_v26 }
 0x52b   : > { %v1962_v23 = vpop.f32.mrf.mxu2  ;;  %2096 = vmatmul.f32.gmra.mxu3 %v2034_v3 }
 0x52c   : > { %v2626_v13 = vpack.i.bf16 %v1962_v23, %v4052_v38  ;;  %v2038_v38 = vsel %vm679_vm0, %v1253_v37, %v2000_v60 }
 0x52e   : > { %2627 = vrot.lane.b32.xlu2 %v2626_v13, %s3036_s30 }
 0x532   : > { %v2002_v51 = vpop.permute.xlu1 %2001 }
 0x533   : > { %2099 = vmatmul.f32.gmra.mxu3 %v2035_v61 }
 0x53b   : > { %2102 = vmatmul.f32.gmra.mxu3 %v2036_v54  ;;  %v2004_v43 = vpop.permute.xlu0 %2003 }
 0x543   : > { %2105 = vmatmul.f32.gmra.mxu3 %v2037_v50 }
 0x54b   : > { %2108 = vmatmul.f32.gmra.mxu3 %v2038_v38 }
 0x55b   : > { %v2006_v49 = vpop.permute.xlu2 %2005 }
 0x57a   : > { %v1256_v14 = vpop.f32.mrf.mxu0 }
 0x57b   : > { %v2039_v56 = vsel %vm679_vm0, %v1256_v14, %v2002_v51 }
 0x57c   : > { %v2008_v18 = vpop.permute.xlu1 %2007  ;;  %2111 = vmatmul.f32.gmra.mxu3 %v2039_v56 }
 0x582   : > { %v1259_v2 = vpop.f32.mrf.mxu0 }
 0x583   : > { %v2040_v41 = vsel %vm679_vm0, %v1259_v2, %v2004_v43 }
 0x584   : > { %v2633_v32 = vpop.permute.xlu1 %2632  ;;  %2114 = vmatmul.f32.gmra.mxu3 %v2040_v41 }
 0x585   : > { %v2635_v40 = vunpack.i.h.bf16 %v2633_v32  ;;  %v2634_v63 = vunpack.i.l.bf16 %v2633_v32 }
 0x587   : > { %v2030_v33 = vsel %vm679_vm0, %v4154_v62, %v2635_v40  ;;  %v2029_v21 = vsel %vm679_vm0, %v4141_v42, %v2634_v63  ;;  %v4205_v42 = vld [vmem:[%s4306_s5] ss:$0 sm:$0xff] }
 0x588   : > { %v2628_v48 = vpop.permute.xlu2 %2627  ;;  %2081 = vmatmul.f32.vlgmr.msra.gmra.mxu0 %v2029_v21  ;;  %2084 = vmatmul.f32.vlgmr.msra.gmra.mxu1 %v2030_v33 }
 0x589   : > { %v2629_v0 = vunpack.i.l.bf16 %v2628_v48  ;;  %v2630_v5 = vunpack.i.h.bf16 %v2628_v48 }
 0x58a   : > { %v1262_v7 = vpop.f32.mrf.mxu0 }
 0x58b   : > { %v2031_v36 = vsel %vm679_vm0, %v4165_v27, %v2629_v0  ;;  %v2041_v28 = vsel %vm679_vm0, %v1262_v7, %v2006_v49 }
 0x58c   : > { %2087 = vmatmul.f32.vlgmr.msra.gmra.mxu2 %v2031_v36  ;;  %2117 = vmatmul.f32.gmra.mxu3 %v2041_v28 }
 0x592   : > { %v1265_v20 = vpop.f32.mrf.mxu0 }
 0x593   : > { %v2042_v34 = vsel %vm679_vm0, %v1265_v20, %v2008_v18 }
 0x594   : > { %2120 = vmatmul.f32.gmra.mxu3 %v2042_v34 }
 0x596   : > { %v2010_v19 = vpop.permute.xlu0 %2009 }
 0x599   : > { %v2091_v62 = vpop.f32.mrf.mxu3 }
 0x59a   : > { %v2092_v39 = vadd.f32 %v4205_v42, %v2091_v62  ;;  %v1268_v27 = vpop.f32.mrf.mxu0 }
 0x59b   : > { %v2043_v57 = vsel %vm679_vm0, %v1268_v27, %v2010_v19 }
 0x59c   : > { %2133 = vst [vmem:[%s4210_s14 + $0x18] sm:$0xff] %v2092_v39  ;;  %2123 = vmatmul.f32.gmra.mxu3 %v2043_v57 }
 0x5a2   : > { %v1271_v22 = vpop.f32.mrf.mxu0 }
 0x5a3   : > { %v2044_v55 = vsel %vm679_vm0, %v1271_v22, %v2630_v5 }
 0x5a4   : > { %2126 = vmatmul.f32.gmra.mxu3 %v2044_v55 }
 0x5a6   : > { %v2094_v59 = vpop.f32.mrf.mxu3 }
 0x5a7   : > { %v2095_v35 = vadd.f32 %v4205_v42, %v2094_v59 }
 0x5a9   : > { %2134 = vst [vmem:[%s4210_s14 + $0x20] sm:$0xff] %v2095_v35 }
 0x5ae   : > { %v2097_v6 = vpop.f32.mrf.mxu3 }
 0x5af   : > { %v2098_v53 = vadd.f32 %v4205_v42, %v2097_v6 }
 0x5b1   : > { %2135 = vst [vmem:[%s4210_s14 + $0x28] sm:$0xff] %v2098_v53 }
 0x5b2   : > { %2944 = shalt.err (!%p2941_p11)
}
 0x5b3   : > { %s3037_s30 = smov 128   ;;  %s3038_s10 = smov 8  }
 0x5b4   : > { %2509 = dma.vmem_to_hbm [thread:$0]  (%p3165_p7), %s2182_s29, 4096, %s2184_s9, %s2152_s13, %s3037_s30, %s3037_s30, %s3038_s10  }
 0x5b5   : > { %s2442_s17 = sshll.u32 %s3100_s28, 7  ;;  %s2164_s29 = sshll.u32 %s4210_s14, 4  ;;  %s2165_s29 = int_to_ptr.vmem [resolvable:$true] %s2164_s29 }
 0x5b6   : > { %v2100_v10 = vpop.f32.mrf.mxu3  ;;  %s2163_s22 = scalar_lea.hbm %s4307_s6, %s2442_s17  ;;  %s2147_s23 = scalar_lea.sflag [#allocation4], %s3220_s3 }
 0x5b7   : > { %v2101_v46 = vadd.f32 %v4205_v42, %v2100_v10  ;;  %s2166_s18 = sshll.u32 %s2163_s22, 4  ;;  %s2965_s4 = scalar_lea.hbm %s4307_s6, 256  ;;  %s2167_s18 = int_to_ptr.hbm [resolvable:$true] %s2166_s18 }
 0x5b8   : > { %s2959_s21 = sshra.s32 %s2167_s18, 4  ;;  %s2960_s21 = int_to_ptr.hbm [resolvable:$true] %s2959_s21 }
 0x5b9   : > { %2136 = vst [vmem:[%s4210_s14 + $0x30] sm:$0xff] %v2101_v46  ;;  %s2961_s28 = scalar_lea.hbm %s2960_s21, 128  ;;  %p2966_p3 = scmp.lt.s32.totalorder %s2960_s21, %s4307_s6 }
 0x5ba   : > { %p2962_p12 = scmp.ne.s32.totalorder %s2960_s21, %s2961_s28  ;;  %p2967_p5 = scmp.lt.s32.totalorder %s2965_s4, %s2961_s28 }
 0x5bc   : > { %p2963_p13 = pnand %p2962_p12, %p3165_p7  ;;  %p2968_p1 = por %p2967_p5, %p2966_p3 }
 0x5be   : > { %v2103_v58 = vpop.f32.mrf.mxu3  ;;  %p2964_p0 = pneg %p2963_p13 }
 0x5bf   : > { %v2104_v8 = vadd.f32 %v4205_v42, %v2103_v58 }
 0x5c0   : > { %p2969_p4 = pnand %p2968_p1, %p2964_p0 }
 0x5c1   : > { %2137 = vst [vmem:[%s4210_s14 + $0x38] sm:$0xff] %v2104_v8 }
 0x5c6   : > { %v2106_v1 = vpop.f32.mrf.mxu3 }
 0x5c7   : > { %v2107_v47 = vadd.f32 %v4205_v42, %v2106_v1 }
 0x5c9   : > { %2138 = vst [vmem:[%s4210_s14 + $0x40] sm:$0xff] %v2107_v47 }
 0x5ce   : > { %v2109_v9 = vpop.f32.mrf.mxu3 }
 0x5cf   : > { %v2110_v12 = vadd.f32 %v4205_v42, %v2109_v9 }
 0x5d1   : > { %2139 = vst [vmem:[%s4210_s14 + $0x48] sm:$0xff] %v2110_v12 }
 0x5ff   : > { %v2112_v25 = vpop.f32.mrf.mxu3 }
 0x600   : > { %v2113_v16 = vadd.f32 %v4205_v42, %v2112_v25 }
 0x602   : > { %2140 = vst [vmem:[%s4210_s14 + $0x50] sm:$0xff] %v2113_v16 }
 0x605   : > { %v2082_v4 = vpop.f32.mrf.mxu0  ;;  %v2085_v15 = vpop.f32.mrf.mxu1 }
 0x606   : > { %v2083_v17 = vadd.f32 %v4205_v42, %v2082_v4  ;;  %v2086_v31 = vadd.f32 %v4205_v42, %v2085_v15 }
 0x607   : > { %v2115_v24 = vpop.f32.mrf.mxu3 }
 0x608   : > { %2130 = vst [vmem:[%s4210_s14] sm:$0xff] %v2083_v17  ;;  %v2116_v30 = vadd.f32 %v4205_v42, %v2115_v24 }
 0x609   : > { %2131 = vst [vmem:[%s4210_s14 + $0x8] sm:$0xff] %v2086_v31 }
 0x60a   : > { %2141 = vst [vmem:[%s4210_s14 + $0x58] sm:$0xff] %v2116_v30 }
 0x60f   : > { %v2088_v11 = vpop.f32.mrf.mxu2  ;;  %v2118_v23 = vpop.f32.mrf.mxu3 }
 0x610   : > { %v2089_v3 = vadd.f32 %v4205_v42, %v2088_v11  ;;  %v2119_v13 = vadd.f32 %v4205_v42, %v2118_v23 }
 0x612   : > { %2132 = vst [vmem:[%s4210_s14 + $0x10] sm:$0xff] %v2089_v3 }
 0x613   : > { %2142 = vst [vmem:[%s4210_s14 + $0x60] sm:$0xff] %v2119_v13 }
 0x617   : > { %v2121_v45 = vpop.f32.mrf.mxu3 }
 0x618   : > { %v2122_v61 = vadd.f32 %v4205_v42, %v2121_v45 }
 0x61a   : > { %2143 = vst [vmem:[%s4210_s14 + $0x68] sm:$0xff] %v2122_v61 }
 0x61f   : > { %v2124_v52 = vpop.f32.mrf.mxu3 }
 0x620   : > { %v2125_v26 = vadd.f32 %v4205_v42, %v2124_v52 }
 0x622   : > { %2144 = vst [vmem:[%s4210_s14 + $0x70] sm:$0xff] %v2125_v26 }
 0x627   : > { %v2127_v54 = vpop.f32.mrf.mxu3 }
 0x628   : > { %v2128_v29 = vadd.f32 %v4205_v42, %v2127_v54 }
 0x62a   : > { %2145 = vst [vmem:[%s4210_s14 + $0x78] sm:$0xff] %v2128_v29 }
 0x62b   : > { %2972 = shalt.err (!%p2969_p4)
}
 0x62c   : > { %2508 = dma.vmem_to_hbm [thread:$0]  (%p3165_p7), %s2165_s29, 2048, %s2167_s18, %s2147_s23, %s3037_s30, %s3037_s30, %s3038_s10  }
 0x62d PF: > { %s2198_s3 = sand.u32 1, %s3015_s24   ;;  %p4347_p8 = scmp.ge.s32.totalorder %s3027_s27, 2 }
 0x62e   : > { %s2199_s14 = scalar_lea.sflag [#allocation4], %s2198_s3 }
 0x62f   : > { %p2530_p2 = pnand %p4347_p8, %p3114_p6 }
 0x631   : > { %p2531_p10 = pneg %p2530_p2 }
 0x633   : > { %3006 = dma.done.wait (%p2531_p10), %s2199_s14, 2048  }
 0x634   : > { %3008 = vsyncadd (%p2531_p10), %s2199_s14, 4294965248  ;;  %s2209_s16 = scalar_lea.sflag [#allocation13], %s2198_s3 }
 0x635   : > { %3010 = dma.done.wait (%p2531_p10), %s2209_s16, 4096  }
 0x636   : > { %3012 = vsyncadd (%p2531_p10), %s2209_s16, 4294963200  ;;  %s4348_s27 = sld [smem:[#allocation21_spill]]  ;;  %s4351_s24 = smov %s3019_s25 }
 0x637   : > { %s4349_s15 = sld [smem:[#allocation20_spill]] }
 0x638   : > { %s4350_s26 = sld [smem:[#allocation22_spill]] }
 0x63c   : > { %p28_p7 = scmp.ge.s32.totalorder %s4348_s27, 4  }
 0x63d   : > { %s4352_s25 = smov %s4349_s15 }
 0x63e   :  { %30 = sbr.rel (!%p28_p7) target bundleno = 15 (0xf), region = 132 }
 0x643   :  { %2215 = vsyncpa [#allocation3], 1 }
 0x644   :  { %2217 = vsyncpa [#allocation3 + $0x1], 1 }
 0x645   :  { %2218 = vsyncpa [#allocation6], 1 }
 0x646   :  { %2220 = vsyncpa [#allocation6 + $0x1], 1 }
 0x647   :  { %2221 = vsyncpa [#allocation9], 1 }
 0x648   :  { %2222 = vsyncpa [#allocation4], 1 }
 0x649   :  { %2224 = vsyncpa [#allocation4 + $0x1], 1 }
 0x64a   :  { %2225 = vsyncpa [#allocation13], 1 }
 0x64b   :  { %2227 = vsyncpa [#allocation13 + $0x1], 1 }

</bundles_post_ra>
